<compile_context>
chip_gen: v5e
topology: v5e:2x2
jax: 0.10.0
libtpu: 0.0.40
codegen_flags: <defaults>
</compile_context>

<pallas_src>
import functools
import math

import jax
import jax.numpy as jnp
from jax.experimental import pallas as pl
from jax.experimental.pallas import tpu as pltpu

EPS = 1e-5
LEAKY_SLOPE = 0.01          # nn.LeakyReLU() default negative_slope


def _leaky(x):
    return jnp.where(x > 0, x, LEAKY_SLOPE * x)


def fold_bn(bn):
    """Eval-mode BatchNorm2d -> per-channel (scale, bias)."""
    scale = bn["gamma"] / jnp.sqrt(bn["var"] + EPS)
    bias = bn["beta"] - bn["mean"] * scale
    return scale.astype(jnp.float32), bias.astype(jnp.float32)


def bn_params(c):
    # fresh nn.BatchNorm2d: gamma=1, beta=0, running_mean=0, running_var=1
    return dict(gamma=jnp.ones((c,), jnp.float32), beta=jnp.zeros((c,), jnp.float32),
                mean=jnp.zeros((c,), jnp.float32), var=jnp.ones((c,), jnp.float32))


def _choose_tile_rows(H, W, C, Cout):
    """Largest power-of-two row block TH dividing H whose f32 working set stays modest,
    while keeping the matmul / store M = TH*W at >= ~256."""
    budget = 8 * 1024 * 1024                       # bytes of per-step f32 intermediates
    th = H
    while th % 2 == 0 and th > 8:
        used = (th + 2) * (W + 2) * C * 4 + th * W * (2 * C + Cout) * 4
        if used <= budget or th * W <= 256:
            break
        th //= 2
    return th


# --------------------------------------------------------------------------------------- #
# fused kernel: one (batch, row-block) tile per grid step
# --------------------------------------------------------------------------------------- #
def _dwsep_kernel(x_ref, wdw_ref, b1_ref, wpw_ref, b2_ref, o_ref, *, TH, W):
    """x_ref  : (1, H+2, W+2, C)  bf16  padded NHWC image of batch n (resident across row blocks)
       wdw_ref: (3, 3, C)         f32   depthwise weights, BN1 scale folded in
       b1_ref : (1, C)            f32   BN1 bias
       wpw_ref: (Cout, C)         bf16  pointwise weights, BN2 scale folded in
       b2_ref : (Cout, 1)         f32   BN2 bias
       o_ref  : (1, 1, Cout, TH*W) f32  lane-dense output slab for this row block"""
    hb = pl.program_id(1)
    r0 = pl.multiple_of(hb * TH, TH)
    rows = x_ref[0, pl.ds(r0, TH + 2), :, :].astype(jnp.float32)     # (TH+2, W+2, C)
    C = rows.shape[-1]

    # depthwise 3x3 (BN1 scale already folded into the weights), f32 accumulation on the VPU
    acc = jnp.zeros((TH, W, C), jnp.float32)
    for kh in range(3):
        for kw in range(3):
            # TODO(synk): route the kw column shift through pltpu.roll (XLU slot) if the
            # unaligned sublane slices ever become the vld/VPU bottleneck.
            acc = acc + rows[kh:kh + TH, kw:kw + W, :] * wdw_ref[kh, kw:kw + 1, :]

    # depthwise BN bias + LeakyReLU in f32
    y = _leaky(acc + b1_ref[...])                                     # (TH, W, C)

    # pointwise 1x1 conv on the MXU, emitting the lane-dense (Cout, TH*W) layout directly
    # (contraction over the channel/lane axis of both operands, i.e. A @ B^T).
    y2d = y.reshape(TH * W, C).astype(jnp.bfloat16)                   # (TH*W, C)
    z = jnp.einsum("oc,pc->op", wpw_ref[...], y2d,
                   preferred_element_type=jnp.float32)                # (Cout, TH*W) f32

    # pointwise BN bias + LeakyReLU, lane-dense store (last dim TH*W, a multiple of 128)
    o_ref[0, 0] = _leaky(z + b2_ref[...]).astype(o_ref.dtype)


def depthwise_separable_conv(x_nchw, dw_w, bn1, pw_w, bn2):
    """PyTorch-equivalent forward.  x:(N,C,H,W)  dw_w:(C,1,3,3)  pw_w:(Cout,C,1,1) -> (N,Cout,H,W)."""
    N, C, H, W = x_nchw.shape
    Cout = pw_w.shape[0]
    TH = _choose_tile_rows(H, W, C, Cout)
    HB = H // TH

    s1, b1 = fold_bn(bn1)
    s2, b2 = fold_bn(bn2)

    # NCHW -> NHWC, bf16 activations in HBM, 1-pixel halo pad.
    # TODO(synk): accept/emit NHWC end-to-end (and replace the pad with in-kernel edge masking)
    # to remove these extra HBM passes over the activation.
    x = jnp.transpose(x_nchw, (0, 2, 3, 1)).astype(jnp.bfloat16)
    xpad = jnp.pad(x, ((0, 0), (1, 1), (1, 1), (0, 0)))               # (N, H+2, W+2, C)

    # Fold the BN scales into the conv weights; only the bias adds remain in the kernel.
    w_dw = (jnp.transpose(dw_w[:, 0], (1, 2, 0)) * s1[None, None, :]).astype(jnp.float32)  # (3,3,C)
    w_pw = (pw_w[:, :, 0, 0] * s2[:, None]).astype(jnp.bfloat16)                           # (Cout,C)
    b1_2d = b1.reshape(1, C)
    b2_2d = b2.reshape(Cout, 1)

    # VMEM budget: double-buffered I/O blocks + weights + per-step f32 intermediates.
    act_blk = (H + 2) * (W + 2) * C * 2
    out_blk = Cout * TH * W * 4
    wgt = 9 * C * 4 + Cout * C * 2 + C * 4 + Cout * 4
    interm = (TH + 2) * (W + 2) * C * 4 + TH * W * (2 * C + Cout) * 4
    est = 2 * (act_blk + out_blk) + wgt + interm
    vmem_limit = int(min(max(4 * est, 32 * 2 ** 20), 48 * 2 ** 20))

    out = pl.pallas_call(
        functools.partial(_dwsep_kernel, TH=TH, W=W),
        out_shape=jax.ShapeDtypeStruct((N, HB, Cout, TH * W), jnp.float32),
        grid_spec=pltpu.PrefetchScalarGridSpec(
            num_scalar_prefetch=0,
            grid=(N, HB),
            in_specs=[
                # single halo'd input block: whole padded image of batch n, constant over the
                # row-block axis -> DMA'd once per batch and kept resident in VMEM
                pl.BlockSpec((1, H + 2, W + 2, C), lambda n, h: (n, 0, 0, 0)),
                pl.BlockSpec((3, 3, C), lambda n, h: (0, 0, 0)),      # depthwise weight (BN1 folded)
                pl.BlockSpec((1, C), lambda n, h: (0, 0)),            # BN1 bias
                pl.BlockSpec((Cout, C), lambda n, h: (0, 0)),         # pointwise weight (BN2 folded)
                pl.BlockSpec((Cout, 1), lambda n, h: (0, 0)),         # BN2 bias
            ],
            out_specs=pl.BlockSpec((1, 1, Cout, TH * W), lambda n, h: (n, h, 0, 0)),
        ),
        compiler_params=pltpu.CompilerParams(
            dimension_semantics=("parallel", "arbitrary"),
            vmem_limit_bytes=vmem_limit),
    )(xpad, w_dw, b1_2d, w_pw, b2_2d)

    # (N, HB, Cout, TH*W) -> NCHW
    out = out.reshape(N, HB, Cout, TH, W)
    out = jnp.transpose(out, (0, 2, 1, 3, 4)).reshape(N, Cout, H, W)
    return out


# --------------------------------------------------------------------------------------- #
# pure-JAX reference (same eval-mode BN fold) for a tolerance check
# --------------------------------------------------------------------------------------- #
def reference_fwd(x, dw_w, bn1, pw_w, bn2):
    dn = ("NCHW", "OIHW", "NCHW")
    h = jax.lax.conv_general_dilated(x, dw_w, window_strides=(1, 1),
                                     padding=((1, 1), (1, 1)),
                                     dimension_numbers=dn,
                                     feature_group_count=x.shape[1])
    s1, b1 = fold_bn(bn1)
    h = _leaky(h * s1[None, :, None, None] + b1[None, :, None, None])
    z = jax.lax.conv_general_dilated(h, pw_w, window_strides=(1, 1),
                                     padding=((0, 0), (0, 0)),
                                     dimension_numbers=dn)
    s2, b2 = fold_bn(bn2)
    return _leaky(z * s2[None, :, None, None] + b2[None, :, None, None])


# --------------------------------------------------------------------------------------- #
if __name__ == "__main__":
    B, in_ch, out_ch, H, W = 2, 4, 8, 16, 16

    key = jax.random.PRNGKey(0)
    kx, kd, kp = jax.random.split(key, 3)
    x = jax.random.normal(kx, (B, in_ch, H, W), jnp.float32)
    dw_w = jax.random.normal(kd, (in_ch, 1, 3, 3), jnp.float32) / 3.0
    pw_w = jax.random.normal(kp, (out_ch, in_ch, 1, 1), jnp.float32) / math.sqrt(in_ch)
    bn1, bn2 = bn_params(in_ch), bn_params(out_ch)

    out = depthwise_separable_conv(x, dw_w, bn1, pw_w, bn2)
    out = jax.block_until_ready(out)

    assert out.shape == (B, out_ch, H, W), out.shape
    assert bool(jnp.all(jnp.isfinite(out)))

    ref = reference_fwd(x, dw_w, bn1, pw_w, bn2)
    # bf16 HBM activations + bf16 MXU operands -> allow ~1% tolerance vs the f32 reference
    assert bool(jnp.allclose(out, ref, rtol=5e-2, atol=5e-2)), \
        float(jnp.max(jnp.abs(out - ref)))

    print("KERNEL_OK")
</pallas_src>

<mosaic_0001>
module attributes {stable_mosaic.version = 11 : i64} {
  func.func @_dwsep_kernel(%arg0: i32, %arg1: i32, %arg2: memref<1x18x18x4xbf16, #tpu.memory_space<vmem>>, %arg3: memref<3x3x4xf32, #tpu.memory_space<vmem>>, %arg4: memref<1x4xf32, #tpu.memory_space<vmem>>, %arg5: memref<8x4xbf16, #tpu.memory_space<vmem>>, %arg6: memref<8x1xf32, #tpu.memory_space<vmem>>, %arg7: memref<1x1x8x256xf32, #tpu.memory_space<vmem>>) attributes {dimension_semantics = [#tpu.dimension_semantics<parallel>, #tpu.dimension_semantics<arbitrary>], iteration_bounds = array<i64: 2, 1>, scalar_prefetch = 0 : i64, scratch_operands = 0 : i64, tpu.core_type = #tpu.core_type<tc>, window_params = [{transform_indices = @transform_0, window_bounds = array<i64: 1, 18, 18, 4>}, {pipeline_mode = #tpu.pipeline_mode<synchronous>, transform_indices = @transform_1, window_bounds = array<i64: 3, 3, 4>}, {pipeline_mode = #tpu.pipeline_mode<synchronous>, transform_indices = @transform_2, window_bounds = array<i64: 1, 4>}, {pipeline_mode = #tpu.pipeline_mode<synchronous>, transform_indices = @transform_3, window_bounds = array<i64: 8, 4>}, {pipeline_mode = #tpu.pipeline_mode<synchronous>, transform_indices = @transform_4, window_bounds = array<i64: 8, 1>}, {transform_indices = @transform_5, window_bounds = array<i64: 1, 1, 8, 256>}]} {
    %c16_i32 = arith.constant 16 : i32
    %0 = arith.muli %arg1, %c16_i32 : i32
    %1 = tpu.assume_multiple %0, 16 : i32
    %c0 = arith.constant 0 : index
    %2 = arith.index_cast %1 : i32 to index
    %c0_0 = arith.constant 0 : index
    %c0_1 = arith.constant 0 : index
    %3 = vector.load %arg2[%c0, %2, %c0_0, %c0_1] : memref<1x18x18x4xbf16, #tpu.memory_space<vmem>>, vector<1x18x18x4xbf16>
    %4 = vector.shape_cast %3 : vector<1x18x18x4xbf16> to vector<18x18x4xbf16>
    %5 = arith.extf %4 : vector<18x18x4xbf16> to vector<18x18x4xf32>
    %cst = arith.constant 0.000000e+00 : f32
    %6 = vector.broadcast %cst : f32 to vector<16x16x4xf32>
    %7 = vector.extract_strided_slice %5 {offsets = [0, 0, 0], sizes = [16, 16, 4], strides = [1, 1, 1]} : vector<18x18x4xf32> to vector<16x16x4xf32>
    %c0_2 = arith.constant 0 : index
    %c0_3 = arith.constant 0 : index
    %c0_4 = arith.constant 0 : index
    %8 = vector.load %arg3[%c0_2, %c0_3, %c0_4] : memref<3x3x4xf32, #tpu.memory_space<vmem>>, vector<1x1x4xf32>
    %9 = vector.shape_cast %8 : vector<1x1x4xf32> to vector<1x4xf32>
    %10 = vector.shape_cast %9 : vector<1x4xf32> to vector<1x1x4xf32>
    %11 = vector.broadcast %10 : vector<1x1x4xf32> to vector<16x16x4xf32>
    %12 = arith.mulf %7, %11 : vector<16x16x4xf32>
    %13 = arith.addf %6, %12 : vector<16x16x4xf32>
    %14 = vector.extract_strided_slice %5 {offsets = [0, 1, 0], sizes = [16, 16, 4], strides = [1, 1, 1]} : vector<18x18x4xf32> to vector<16x16x4xf32>
    %c0_5 = arith.constant 0 : index
    %c1 = arith.constant 1 : index
    %c0_6 = arith.constant 0 : index
    %15 = vector.load %arg3[%c0_5, %c1, %c0_6] : memref<3x3x4xf32, #tpu.memory_space<vmem>>, vector<1x1x4xf32>
    %16 = vector.shape_cast %15 : vector<1x1x4xf32> to vector<1x4xf32>
    %17 = vector.shape_cast %16 : vector<1x4xf32> to vector<1x1x4xf32>
    %18 = vector.broadcast %17 : vector<1x1x4xf32> to vector<16x16x4xf32>
    %19 = arith.mulf %14, %18 : vector<16x16x4xf32>
    %20 = arith.addf %13, %19 : vector<16x16x4xf32>
    %21 = vector.extract_strided_slice %5 {offsets = [0, 2, 0], sizes = [16, 16, 4], strides = [1, 1, 1]} : vector<18x18x4xf32> to vector<16x16x4xf32>
    %c0_7 = arith.constant 0 : index
    %c2 = arith.constant 2 : index
    %c0_8 = arith.constant 0 : index
    %22 = vector.load %arg3[%c0_7, %c2, %c0_8] : memref<3x3x4xf32, #tpu.memory_space<vmem>>, vector<1x1x4xf32>
    %23 = vector.shape_cast %22 : vector<1x1x4xf32> to vector<1x4xf32>
    %24 = vector.shape_cast %23 : vector<1x4xf32> to vector<1x1x4xf32>
    %25 = vector.broadcast %24 : vector<1x1x4xf32> to vector<16x16x4xf32>
    %26 = arith.mulf %21, %25 : vector<16x16x4xf32>
    %27 = arith.addf %20, %26 : vector<16x16x4xf32>
    %28 = vector.extract_strided_slice %5 {offsets = [1, 0, 0], sizes = [16, 16, 4], strides = [1, 1, 1]} : vector<18x18x4xf32> to vector<16x16x4xf32>
    %c1_9 = arith.constant 1 : index
    %c0_10 = arith.constant 0 : index
    %c0_11 = arith.constant 0 : index
    %29 = vector.load %arg3[%c1_9, %c0_10, %c0_11] : memref<3x3x4xf32, #tpu.memory_space<vmem>>, vector<1x1x4xf32>
    %30 = vector.shape_cast %29 : vector<1x1x4xf32> to vector<1x4xf32>
    %31 = vector.shape_cast %30 : vector<1x4xf32> to vector<1x1x4xf32>
    %32 = vector.broadcast %31 : vector<1x1x4xf32> to vector<16x16x4xf32>
    %33 = arith.mulf %28, %32 : vector<16x16x4xf32>
    %34 = arith.addf %27, %33 : vector<16x16x4xf32>
    %35 = vector.extract_strided_slice %5 {offsets = [1, 1, 0], sizes = [16, 16, 4], strides = [1, 1, 1]} : vector<18x18x4xf32> to vector<16x16x4xf32>
    %c1_12 = arith.constant 1 : index
    %c1_13 = arith.constant 1 : index
    %c0_14 = arith.constant 0 : index
    %36 = vector.load %arg3[%c1_12, %c1_13, %c0_14] : memref<3x3x4xf32, #tpu.memory_space<vmem>>, vector<1x1x4xf32>
    %37 = vector.shape_cast %36 : vector<1x1x4xf32> to vector<1x4xf32>
    %38 = vector.shape_cast %37 : vector<1x4xf32> to vector<1x1x4xf32>
    %39 = vector.broadcast %38 : vector<1x1x4xf32> to vector<16x16x4xf32>
    %40 = arith.mulf %35, %39 : vector<16x16x4xf32>
    %41 = arith.addf %34, %40 : vector<16x16x4xf32>
    %42 = vector.extract_strided_slice %5 {offsets = [1, 2, 0], sizes = [16, 16, 4], strides = [1, 1, 1]} : vector<18x18x4xf32> to vector<16x16x4xf32>
    %c1_15 = arith.constant 1 : index
    %c2_16 = arith.constant 2 : index
    %c0_17 = arith.constant 0 : index
    %43 = vector.load %arg3[%c1_15, %c2_16, %c0_17] : memref<3x3x4xf32, #tpu.memory_space<vmem>>, vector<1x1x4xf32>
    %44 = vector.shape_cast %43 : vector<1x1x4xf32> to vector<1x4xf32>
    %45 = vector.shape_cast %44 : vector<1x4xf32> to vector<1x1x4xf32>
    %46 = vector.broadcast %45 : vector<1x1x4xf32> to vector<16x16x4xf32>
    %47 = arith.mulf %42, %46 : vector<16x16x4xf32>
    %48 = arith.addf %41, %47 : vector<16x16x4xf32>
    %49 = vector.extract_strided_slice %5 {offsets = [2, 0, 0], sizes = [16, 16, 4], strides = [1, 1, 1]} : vector<18x18x4xf32> to vector<16x16x4xf32>
    %c2_18 = arith.constant 2 : index
    %c0_19 = arith.constant 0 : index
    %c0_20 = arith.constant 0 : index
    %50 = vector.load %arg3[%c2_18, %c0_19, %c0_20] : memref<3x3x4xf32, #tpu.memory_space<vmem>>, vector<1x1x4xf32>
    %51 = vector.shape_cast %50 : vector<1x1x4xf32> to vector<1x4xf32>
    %52 = vector.shape_cast %51 : vector<1x4xf32> to vector<1x1x4xf32>
    %53 = vector.broadcast %52 : vector<1x1x4xf32> to vector<16x16x4xf32>
    %54 = arith.mulf %49, %53 : vector<16x16x4xf32>
    %55 = arith.addf %48, %54 : vector<16x16x4xf32>
    %56 = vector.extract_strided_slice %5 {offsets = [2, 1, 0], sizes = [16, 16, 4], strides = [1, 1, 1]} : vector<18x18x4xf32> to vector<16x16x4xf32>
    %c2_21 = arith.constant 2 : index
    %c1_22 = arith.constant 1 : index
    %c0_23 = arith.constant 0 : index
    %57 = vector.load %arg3[%c2_21, %c1_22, %c0_23] : memref<3x3x4xf32, #tpu.memory_space<vmem>>, vector<1x1x4xf32>
    %58 = vector.shape_cast %57 : vector<1x1x4xf32> to vector<1x4xf32>
    %59 = vector.shape_cast %58 : vector<1x4xf32> to vector<1x1x4xf32>
    %60 = vector.broadcast %59 : vector<1x1x4xf32> to vector<16x16x4xf32>
    %61 = arith.mulf %56, %60 : vector<16x16x4xf32>
    %62 = arith.addf %55, %61 : vector<16x16x4xf32>
    %63 = vector.extract_strided_slice %5 {offsets = [2, 2, 0], sizes = [16, 16, 4], strides = [1, 1, 1]} : vector<18x18x4xf32> to vector<16x16x4xf32>
    %c2_24 = arith.constant 2 : index
    %c2_25 = arith.constant 2 : index
    %c0_26 = arith.constant 0 : index
    %64 = vector.load %arg3[%c2_24, %c2_25, %c0_26] : memref<3x3x4xf32, #tpu.memory_space<vmem>>, vector<1x1x4xf32>
    %65 = vector.shape_cast %64 : vector<1x1x4xf32> to vector<1x4xf32>
    %66 = vector.shape_cast %65 : vector<1x4xf32> to vector<1x1x4xf32>
    %67 = vector.broadcast %66 : vector<1x1x4xf32> to vector<16x16x4xf32>
    %68 = arith.mulf %63, %67 : vector<16x16x4xf32>
    %69 = arith.addf %62, %68 : vector<16x16x4xf32>
    %c0_27 = arith.constant 0 : index
    %c0_28 = arith.constant 0 : index
    %70 = vector.load %arg4[%c0_27, %c0_28] : memref<1x4xf32, #tpu.memory_space<vmem>>, vector<1x4xf32>
    %71 = vector.shape_cast %70 : vector<1x4xf32> to vector<1x1x4xf32>
    %72 = vector.broadcast %71 : vector<1x1x4xf32> to vector<16x16x4xf32>
    %73 = arith.addf %69, %72 : vector<16x16x4xf32>
    %cst_29 = arith.constant 0.000000e+00 : f32
    %74 = vector.broadcast %cst_29 : f32 to vector<16x16x4xf32>
    %75 = arith.cmpf ogt, %73, %74 : vector<16x16x4xf32>
    %cst_30 = arith.constant 0.00999999977 : f32
    %76 = vector.broadcast %cst_30 : f32 to vector<16x16x4xf32>
    %77 = arith.mulf %76, %73 : vector<16x16x4xf32>
    %78 = arith.select %75, %73, %77 : vector<16x16x4xi1>, vector<16x16x4xf32>
    %79 = vector.shape_cast %78 : vector<16x16x4xf32> to vector<256x4xf32>
    %80 = arith.truncf %79 : vector<256x4xf32> to vector<256x4xbf16>
    %c0_31 = arith.constant 0 : index
    %c0_32 = arith.constant 0 : index
    %81 = vector.load %arg5[%c0_31, %c0_32] : memref<8x4xbf16, #tpu.memory_space<vmem>>, vector<8x4xbf16>
    "tpu.trace_start"() <{level = 10 : i32, message = "oc,pc->op"}> : () -> ()
    %cst_33 = arith.constant dense<0.000000e+00> : vector<8x256xf32>
    %82 = tpu.matmul %81, %80, %cst_33 {dimension_numbers = #tpu.dot_dimension_numbers<[1], [1], [0], [0], [0, 0, 1, 0], [], []>} : vector<8x4xbf16>, vector<256x4xbf16>, vector<8x256xf32> -> vector<8x256xf32>
    "tpu.trace_stop"() : () -> ()
    %c0_34 = arith.constant 0 : index
    %c0_35 = arith.constant 0 : index
    %83 = vector.load %arg6[%c0_34, %c0_35] : memref<8x1xf32, #tpu.memory_space<vmem>>, vector<8x1xf32>
    %84 = vector.broadcast %83 : vector<8x1xf32> to vector<8x256xf32>
    %85 = arith.addf %82, %84 : vector<8x256xf32>
    %cst_36 = arith.constant 0.000000e+00 : f32
    %86 = vector.broadcast %cst_36 : f32 to vector<8x256xf32>
    %87 = arith.cmpf ogt, %85, %86 : vector<8x256xf32>
    %cst_37 = arith.constant 0.00999999977 : f32
    %88 = vector.broadcast %cst_37 : f32 to vector<8x256xf32>
    %89 = arith.mulf %88, %85 : vector<8x256xf32>
    %90 = arith.select %87, %85, %89 : vector<8x256xi1>, vector<8x256xf32>
    %c0_38 = arith.constant 0 : index
    %c0_39 = arith.constant 0 : index
    %c0_40 = arith.constant 0 : index
    %c0_41 = arith.constant 0 : index
    %91 = vector.load %arg7[%c0_38, %c0_39, %c0_40, %c0_41] : memref<1x1x8x256xf32, #tpu.memory_space<vmem>>, vector<1x1x8x256xf32>
    %92 = vector.shape_cast %91 : vector<1x1x8x256xf32> to vector<8x256xf32>
    %93 = vector.shape_cast %90 : vector<8x256xf32> to vector<1x1x8x256xf32>
    tpu.vector_store %arg7[%c0_38, %c0_39, %c0_40, %c0_41], %93 {strides = array<i32>} : memref<1x1x8x256xf32, #tpu.memory_space<vmem>>, vector<1x1x8x256xf32>,
    return
  }
  func.func @transform_0(%arg0: i32, %arg1: i32) -> (i32, i32, i32, i32) {
    %c0_i32 = arith.constant 0 : i32
    %c0_i32_0 = arith.constant 0 : i32
    %c0_i32_1 = arith.constant 0 : i32
    %c0_i32_2 = arith.constant 0 : i32
    return %arg0, %c0_i32, %c0_i32_0, %c0_i32_1 : i32, i32, i32, i32
  }
  func.func @transform_1(%arg0: i32, %arg1: i32) -> (i32, i32, i32) {
    %c0_i32 = arith.constant 0 : i32
    %c0_i32_0 = arith.constant 0 : i32
    %c0_i32_1 = arith.constant 0 : i32
    %c0_i32_2 = arith.constant 0 : i32
    return %c0_i32, %c0_i32_0, %c0_i32_1 : i32, i32, i32
  }
  func.func @transform_2(%arg0: i32, %arg1: i32) -> (i32, i32) {
    %c0_i32 = arith.constant 0 : i32
    %c0_i32_0 = arith.constant 0 : i32
    %c0_i32_1 = arith.constant 0 : i32
    return %c0_i32, %c0_i32_0 : i32, i32
  }
  func.func @transform_3(%arg0: i32, %arg1: i32) -> (i32, i32) {
    %c0_i32 = arith.constant 0 : i32
    %c0_i32_0 = arith.constant 0 : i32
    %c0_i32_1 = arith.constant 0 : i32
    return %c0_i32, %c0_i32_0 : i32, i32
  }
  func.func @transform_4(%arg0: i32, %arg1: i32) -> (i32, i32) {
    %c0_i32 = arith.constant 0 : i32
    %c0_i32_0 = arith.constant 0 : i32
    %c0_i32_1 = arith.constant 0 : i32
    return %c0_i32, %c0_i32_0 : i32, i32
  }
  func.func @transform_5(%arg0: i32, %arg1: i32) -> (i32, i32, i32, i32) {
    %c0_i32 = arith.constant 0 : i32
    %c0_i32_0 = arith.constant 0 : i32
    %c0_i32_1 = arith.constant 0 : i32
    return %arg0, %arg1, %c0_i32, %c0_i32_0 : i32, i32, i32, i32
  }
}

</mosaic_0001>

<bundles_post_ra>
// kernel: tpu_custom_call.1
= control target key start
LH: loop header
LB: loop body
LE: loop exit
PB: predicated region body
PF: predicated region fallthrough
CT: control target
= control target key end

     0   :  { %10 = vsyncpa [#allocation3], 0  ;;  %s3997_s0 = inlined_call_operand.vmem [shape: bf16[2,18,18,4], index: 0, kind: input, shape index: {}]   ;;  %s3998_s1 = inlined_call_operand.vmem [shape: f32[3,3,4], index: 1, kind: input, shape index: {}]   ;;  %s3999_s2 = inlined_call_operand.vmem [shape: f32[1,4], index: 2, kind: input, shape index: {}]   ;;  %s4000_s3 = inlined_call_operand.vmem [shape: bf16[8,4], index: 3, kind: input, shape index: {}]   ;;  %s4001_s4 = inlined_call_operand.vmem [shape: f32[8,1], index: 4, kind: input, shape index: {}]   ;;  %s4002_s5 = inlined_call_operand.hbm [shape: f32[2,1,8,256], index: 5, kind: output, shape index: {}]  }
   0x1   :  { %12 = vsyncpa [#allocation3 + $0x1], 0  ;;  %s2599_s18 = smov 0   ;;  %s2601_s19 = smov 0  }
   0x2   :  { %s2603_s20 = smov 0   ;;  %s2605_s21 = smov 0  }
   0x3   :  { %s2607_s22 = smov 0   ;;  %s2609_s23 = smov 0  }
   0x4 LB: > { %s2335_s24 = sadd.s32 4294967295, %s2566_s23   ;;  %s2336_s25 = sadd.s32 4294967294, %s2566_s23   ;;  %s2566_s23 = sphi %s2609_s23, %s18_s23   ;;  %s2562_s22 = sphi %s2607_s22, %s4009_s22   ;;  %s2558_s21 = sphi %s2605_s21, %s4008_s21   ;;  %s2554_s20 = sphi %s2603_s20, %s4007_s20   ;;  %s2550_s19 = sphi %s2601_s19, %s4006_s19   ;;  %s2546_s18 = sphi %s2599_s18, %s4005_s18  }
   0x5   : > { %s30_s26 = sadd.s32 1, %s2562_s22  ;;  %s149_s27 = sadd.s32 1, %s2554_s20 }
   0x6   : > { %p32_p0 = scmp.ge.s32.totalorder %s30_s26, 2  ;;  %p159_p1 = scmp.ne.s32.totalorder %s2554_s20, %s2550_s19 }
   0x7   : > { %p160_p2 = scmp.eq.s32.totalorder %s2335_s24, 1  ;;  %p165_p3 = scmp.ne.s32.totalorder %s2550_s19, %s2546_s18 }
   0x8   : > { %s4011_s26 = smov (%p32_p0, %s30_s26), 0  ;;  %p166_p5 = scmp.eq.s32.totalorder %s2336_s25, 1 }
   0x9   : > { %p2639_p4 = por %p160_p2, %p159_p1  ;;  %s144_s29 = ssub.s32 %s2562_s22, %s4011_s26 }
   0xa   : > { %p2339_p6 = scmp.ge.s32.totalorder %s2566_s23, 1  ;;  %p147_p7 = scmp.eq.s32.totalorder %s144_s29, 0 }
   0xb   : > { %p2646_p8 = por %p166_p5, %p165_p3  ;;  %p204_p9 = scmp.lt.s32.totalorder %s2566_s23, 3 }
   0xc   : > { %s2652_s6 = scalar_select %p147_p7, %s2554_s20, %s149_s27  }
   0xd   : > { %p205_p10 = pnand %p2339_p6, %p204_p9 }
   0xe   : > { %p232_p11 = scmp.lt.s32.totalorder (!%p205_p10), %s2558_s21, 1  ;;  %s229_s25 = sand.u32 (!%p205_p10), 1, %s2550_s19  }
   0xf   : > { %208 = sbr.rel (%p205_p10) target bundleno = 510 (0x1fe), region = 40  ;;  %s2340_s27 = sshll.u32 (!%p205_p10), %s229_s25, 4 }
  0x10   : > { %s231_s29 = scalar_lea.vmem (!%p205_p10), [#allocation2], %s2340_s27  ;;  %s2245_s13 = scalar_lea.sflag (!%p205_p10), [#allocation3], %s229_s25 }
  0x11   : > { %s2260_s11 = sshll.u32 (!%p205_p10), %s231_s29, 4  ;;  %s2508_s17 = scalar_lea.hbm (!%p205_p10), %s4002_s5, 32  ;;  %s2261_s11 = int_to_ptr.vmem [resolvable:$true] %s2260_s11 }
  0x14   : > { %s233_s7 = scalar_select %p232_p11, %s2558_s21, 1  ;;  %v2659_v0 = vld [vmem:[%s3998_s1] ss:$0 sm:$0xff]  ;;  %v2664_v1 = vld [vmem:[%s3998_s1 + $0x1] ss:$0 sm:$0xff]  ;;  %vm513_vm0 = vcmask 1046528  }
  0x15   : > { %v2674_v2 = vld [vmem:[%s3998_s1 + $0x2] ss:$0 sm:$0xff]  ;;  %v2679_v3 = vld [vmem:[%s3998_s1 + $0x4] ss:$0 sm:$0xff]  ;;  %vm756_vm1 = vcmask 1045504   ;;  %vm2158_vm2 = vcmask 31744  }
  0x16   : > { %s2400_s8 = smul.u32 216, %s233_s7  ;;  %v2714_v22 = vld [vmem:[%s3998_s1 + $0x5] ss:$0 sm:$0xff]  ;;  %v2727_v27 = vld [vmem:[%s3998_s1 + $0x6] ss:$0 sm:$0xff]  ;;  %s2355_s7 = sshll.u32 %s2558_s21, 4 }
  0x17   : > { %v2744_v40 = vld [vmem:[%s3998_s1 + $0x8] ss:$0 sm:$0xff]  ;;  %v2755_v49 = vld [vmem:[%s3998_s1 + $0x9] ss:$0 sm:$0xff]  ;;  %v2766_v58 = vld [vmem:[%s3998_s1 + $0xa] ss:$0 sm:$0xff]  ;;  %s2258_s10 = scalar_lea.hbm %s4002_s5, %s2355_s7 }
  0x18   : > { %s2669_s15 = scalar_lea.vmem %s3997_s0, %s2400_s8  ;;  %s2262_s12 = sshll.u32 %s2258_s10, 4  ;;  %s2263_s12 = int_to_ptr.hbm [resolvable:$true] %s2262_s12 }
  0x19   : > { %v262_v4 = vld [vmem:[%s2669_s15 + $0x54] sm:$0xff]   ;;  %v264_v5 = vld [vmem:[%s2669_s15 + $0x5c] sm:$0x1]  ;;  %v2395_v6 = vld [vmem:[%s2669_s15 + $0x60] sm:$0xff]   ;;  %s2502_s14 = sshra.s32 %s2263_s12, 4  ;;  %s2503_s14 = int_to_ptr.hbm [resolvable:$true] %s2502_s14 }
  0x1a   : > { %v2684_v7 = vunpack.c.l.bf16 %v2395_v6  ;;  %v2686_v8 = vunpack.c.h.bf16 %v2395_v6  ;;  %v267_v9 = vld [vmem:[%s2669_s15 + $0x68] sm:$0x1]  ;;  %v268_v10 = vld [vmem:[%s2669_s15 + $0x6c] sm:$0xff]   ;;  %v270_v11 = vld [vmem:[%s2669_s15 + $0x74] sm:$0x1]  ;;  %v2691_v12 = vunpack.c.l.bf16 %v262_v4  ;;  %v2693_v13 = vunpack.c.h.bf16 %v262_v4  ;;  %p2509_p1 = scmp.lt.s32.totalorder %s2503_s14, %s4002_s5 }
  0x1b   : > { %v2695_v14 = vunpack.c.l.bf16 %v264_v5  ;;  %v2697_v15 = vunpack.c.l.bf16 %v267_v9  ;;  %v2699_v16 = vunpack.c.l.bf16 %v268_v10  ;;  %v2701_v17 = vunpack.c.h.bf16 %v268_v10 }
  0x1c   : > { %v2703_v18 = vunpack.c.l.bf16 %v270_v11  ;;  %v365_v19 = vmul.f32 %v2659_v0, %v2691_v12  ;;  %v366_v20 = vmul.f32 %v2659_v0, %v2693_v13  ;;  %v438_v21 = vmul.f32 %v2664_v1, %v2691_v12 }
  0x1d   : > { %v439_v23 = vmul.f32 %v2664_v1, %v2693_v13  ;;  %v440_v24 = vmul.f32 %v2664_v1, %v2695_v14  ;;  %v681_v25 = vmul.f32 %v2674_v2, %v2691_v12  ;;  %v682_v26 = vmul.f32 %v2674_v2, %v2693_v13 }
  0x1e   : > { %v549_v28 = vrot.slane %v438_v21, 1  ;;  %v683_v29 = vmul.f32 %v2674_v2, %v2695_v14  ;;  %v918_v30 = vmul.f32 %v2679_v3, %v2684_v7  ;;  %v919_v31 = vmul.f32 %v2679_v3, %v2686_v8 }
  0x1f   : > { %v550_v32 = vrot.slane %v439_v23, 1  ;;  %v552_v33 = vrot.slane %v440_v24, 1  ;;  %v792_v34 = vrot.slane %v681_v25, 2  ;;  %v793_v35 = vrot.slane %v682_v26, 2 }
  0x20   : > { %v795_v36 = vrot.slane %v683_v29, 2  ;;  %v991_v37 = vmul.f32 %v2714_v22, %v2684_v7  ;;  %v992_v38 = vmul.f32 %v2714_v22, %v2686_v8  ;;  %v993_v39 = vmul.f32 %v2714_v22, %v2697_v15 }
  0x21   : > { %v551_v41 = vsel %vm513_vm0, %v549_v28, %v550_v32  ;;  %v553_v42 = vsel %vm513_vm0, %v550_v32, %v552_v33  ;;  %v794_v43 = vsel %vm756_vm1, %v792_v34, %v793_v35  ;;  %v1233_v44 = vmul.f32 %v2727_v27, %v2684_v7 }
  0x22   : > { %v640_v45 = vadd.f32 %v551_v41, %v365_v19  ;;  %v641_v46 = vadd.f32 %v553_v42, %v366_v20  ;;  %v796_v47 = vsel %vm756_vm1, %v793_v35, %v795_v36  ;;  %v1101_v48 = vrot.slane %v991_v37, 1  ;;  %v2399_v20 = vld [vmem:[%s2669_s15 + $0xc0] sm:$0xff]   ;;  %v288_v35 = vld [vmem:[%s2669_s15 + $0xbc] sm:$0x1]  ;;  %v291_v42 = vld [vmem:[%s2669_s15 + $0xc8] sm:$0x1] }
  0x23   : > { %v1102_v50 = vrot.slane %v992_v38, 1  ;;  %v1104_v51 = vrot.slane %v993_v39, 1  ;;  %v1234_v52 = vmul.f32 %v2727_v27, %v2686_v8  ;;  %v1235_v53 = vmul.f32 %v2727_v27, %v2697_v15 }
  0x24   : > { %v883_v54 = vadd.f32 %v794_v43, %v640_v45  ;;  %v884_v55 = vadd.f32 %v796_v47, %v641_v46  ;;  %v1343_v56 = vrot.slane %v1233_v44, 2  ;;  %v1469_v57 = vmul.f32 %v2744_v40, %v2699_v16  ;;  %v292_v43 = vld [vmem:[%s2669_s15 + $0xcc] sm:$0xff]   ;;  %v2798_v47 = vld [vmem:[%s2669_s15 + $0xd4] sm:$0x1] }
  0x25   : > { %v1103_v59 = vsel %vm513_vm0, %v1101_v48, %v1102_v50  ;;  %v1105_v60 = vsel %vm513_vm0, %v1102_v50, %v1104_v51  ;;  %v1344_v61 = vrot.slane %v1234_v52, 2  ;;  %v1346_v62 = vrot.slane %v1235_v53, 2 }
  0x26   : > { %v950_v63 = vadd.f32 %v918_v30, %v883_v54  ;;  %v951_v4 = vadd.f32 %v919_v31, %v884_v55  ;;  %v1470_v5 = vmul.f32 %v2744_v40, %v2701_v17  ;;  %v1542_v6 = vmul.f32 %v2755_v49, %v2699_v16  ;;  %v286_v31 = vld [vmem:[%s2669_s15 + $0xb4] sm:$0xff]  }
  0x27   : > { %v1345_v9 = vsel %vm756_vm1, %v1343_v56, %v1344_v61  ;;  %v1347_v10 = vsel %vm756_vm1, %v1344_v61, %v1346_v62  ;;  %v1543_v11 = vmul.f32 %v2755_v49, %v2701_v17  ;;  %v1544_v19 = vmul.f32 %v2755_v49, %v2703_v18  ;;  %v2811_v56 = vld [vmem:[%s3999_s2] ss:$0 sm:$0xff] }
  0x28   : > { %v1192_v21 = vadd.f32 %v1103_v59, %v950_v63  ;;  %v1193_v23 = vadd.f32 %v1105_v60, %v951_v4  ;;  %v1652_v24 = vrot.slane %v1542_v6, 1  ;;  %v1784_v25 = vmul.f32 %v2766_v58, %v2699_v16 }
  0x29   : > { %v1653_v26 = vrot.slane %v1543_v11, 1  ;;  %v1655_v28 = vrot.slane %v1544_v19, 1  ;;  %v1785_v29 = vmul.f32 %v2766_v58, %v2701_v17  ;;  %v1786_v30 = vmul.f32 %v2766_v58, %v2703_v18 }
  0x2a   : > { %v1434_v32 = vadd.f32 %v1345_v9, %v1192_v21  ;;  %v1435_v33 = vadd.f32 %v1347_v10, %v1193_v23  ;;  %v1894_v34 = vrot.slane %v1784_v25, 2  ;;  %v2789_v36 = vunpack.c.l.bf16 %v2399_v20 }
  0x2b   : > { %v1654_v37 = vsel %vm513_vm0, %v1652_v24, %v1653_v26  ;;  %v1656_v38 = vsel %vm513_vm0, %v1653_v26, %v1655_v28  ;;  %v1895_v39 = vrot.slane %v1785_v29, 2  ;;  %v1897_v41 = vrot.slane %v1786_v30, 2 }
  0x2c   : > { %v1501_v44 = vadd.f32 %v1469_v57, %v1434_v32  ;;  %v1502_v45 = vadd.f32 %v1470_v5, %v1435_v33  ;;  %v2795_v46 = vunpack.c.h.bf16 %v2399_v20  ;;  %v2800_v48 = vunpack.c.l.bf16 %v286_v31 }
  0x2d   : > { %v1896_v50 = vsel %vm756_vm1, %v1894_v34, %v1895_v39  ;;  %v1898_v51 = vsel %vm756_vm1, %v1895_v39, %v1897_v41  ;;  %v2804_v52 = vunpack.c.h.bf16 %v286_v31  ;;  %v2806_v53 = vunpack.c.l.bf16 %v288_v35 }
  0x2e   : > { %v1743_v54 = vadd.f32 %v1654_v37, %v1501_v44  ;;  %v1744_v55 = vadd.f32 %v1656_v38, %v1502_v45  ;;  %v2813_v57 = vunpack.c.l.bf16 %v291_v42  ;;  %v2815_v59 = vunpack.c.l.bf16 %v292_v43 }
  0x2f   : > { %v2817_v60 = vunpack.c.h.bf16 %v292_v43  ;;  %v348_v61 = vunpack.c.l.bf16 %v2798_v47  ;;  %v381_v62 = vmul.f32 %v2659_v0, %v2800_v48  ;;  %v382_v63 = vmul.f32 %v2659_v0, %v2804_v52 }
  0x30   : > { %v1985_v4 = vadd.f32 %v1896_v50, %v1743_v54  ;;  %v1986_v5 = vadd.f32 %v1898_v51, %v1744_v55  ;;  %v462_v6 = vmul.f32 %v2664_v1, %v2800_v48  ;;  %v463_v9 = vmul.f32 %v2664_v1, %v2804_v52 }
  0x31   : > { %v464_v10 = vmul.f32 %v2664_v1, %v2806_v53  ;;  %v705_v11 = vmul.f32 %v2674_v2, %v2800_v48  ;;  %v706_v19 = vmul.f32 %v2674_v2, %v2804_v52  ;;  %v707_v20 = vmul.f32 %v2674_v2, %v2806_v53 }
  0x32   : > { %v2021_v21 = vadd.f32 %v2811_v56, %v1985_v4  ;;  %v2022_v23 = vadd.f32 %v2811_v56, %v1986_v5  ;;  %v589_v24 = vrot.slane %v462_v6, 1  ;;  %v590_v25 = vrot.slane %v463_v9, 1 }
  0x33   : > { %v592_v26 = vrot.slane %v464_v10, 1  ;;  %v832_v28 = vrot.slane %v705_v11, 2  ;;  %v833_v29 = vrot.slane %v706_v19, 2  ;;  %v835_v30 = vrot.slane %v707_v20, 2 }
  0x34   : > { %vm2053_vm3 = vcmp.gt.f32.partialorder %v2021_v21, 0.0  ;;  %vm2054_vm4 = vcmp.gt.f32.partialorder %v2022_v23, 0.0  ;;  %v2085_v31 = vmul.f32 0.01, %v2021_v21  ;;  %v2086_v32 = vmul.f32 0.01, %v2022_v23 }
  0x35   : > { %v591_v33 = vsel %vm513_vm0, %v589_v24, %v590_v25  ;;  %v593_v34 = vsel %vm513_vm0, %v590_v25, %v592_v26  ;;  %v834_v35 = vsel %vm756_vm1, %v832_v28, %v833_v29  ;;  %v836_v37 = vsel %vm756_vm1, %v833_v29, %v835_v30 }
  0x36   : > { %v2117_v38 = vsel %vm2053_vm3, %v2021_v21, %v2085_v31  ;;  %v2118_v39 = vsel %vm2054_vm4, %v2022_v23, %v2086_v32  ;;  %v656_v41 = vadd.f32 %v591_v33, %v381_v62  ;;  %v657_v42 = vadd.f32 %v593_v34, %v382_v63 }
  0x37   : > { %v2142_v43 = vpack.c.bf16 %v2118_v39, %v2117_v38  ;;  %v934_v44 = vmul.f32 %v2679_v3, %v2789_v36  ;;  %v935_v45 = vmul.f32 %v2679_v3, %v2795_v46  ;;  %v1015_v50 = vmul.f32 %v2714_v22, %v2789_v36  ;;  %v2394_v39 = vld [vmem:[%s2669_s15 + $0x48] sm:$0xff]  }
  0x38   : > { %v899_v51 = vadd.f32 %v834_v35, %v656_v41  ;;  %v900_v54 = vadd.f32 %v836_v37, %v657_v42  ;;  %v1016_v55 = vmul.f32 %v2714_v22, %v2795_v46  ;;  %v1017_v4 = vmul.f32 %v2714_v22, %v2813_v57 }
  0x39   : > { %v2184_v62 = vsel %vm2158_vm2, %v2142_v43, 0  ;;  %v1141_v63 = vrot.slane %v1015_v50, 1  ;;  %v1257_v5 = vmul.f32 %v2727_v27, %v2789_v36  ;;  %v1258_v6 = vmul.f32 %v2727_v27, %v2795_v46 }
  0x3a   : > { %2210 = vmatpush.bf16.xpose.msra.mxu0 %v2184_v62  ;;  %v966_v9 = vadd.f32 %v934_v44, %v899_v51  ;;  %v967_v10 = vadd.f32 %v935_v45, %v900_v54  ;;  %v1142_v11 = vrot.slane %v1016_v55, 1  ;;  %v1144_v19 = vrot.slane %v1017_v4, 1  ;;  %v261_v55 = vld [vmem:[%s2669_s15 + $0x50] sm:$0x1] }
  0x3b   : > { %v1259_v20 = vmul.f32 %v2727_v27, %v2813_v57  ;;  %v1383_v21 = vrot.slane %v1257_v5, 2  ;;  %v1384_v23 = vrot.slane %v1258_v6, 2  ;;  %v1485_v24 = vmul.f32 %v2744_v40, %v2815_v59 }
  0x3c   : > { %v1143_v25 = vsel %vm513_vm0, %v1141_v63, %v1142_v11  ;;  %v1145_v26 = vsel %vm513_vm0, %v1142_v11, %v1144_v19  ;;  %v1486_v28 = vmul.f32 %v2744_v40, %v2817_v60  ;;  %v1566_v29 = vmul.f32 %v2755_v49, %v2815_v59 }
  0x3d   : > { %v1208_v30 = vadd.f32 %v1143_v25, %v966_v9  ;;  %v1209_v31 = vadd.f32 %v1145_v26, %v967_v10  ;;  %v1385_v32 = vsel %vm756_vm1, %v1383_v21, %v1384_v23  ;;  %v1386_v33 = vrot.slane %v1259_v20, 2 }
  0x3e   : > { %v1567_v34 = vmul.f32 %v2755_v49, %v2817_v60  ;;  %v1568_v35 = vmul.f32 %v2755_v49, %v348_v61  ;;  %v1692_v37 = vrot.slane %v1566_v29, 1  ;;  %v1808_v38 = vmul.f32 %v2766_v58, %v2815_v59 }
  0x3f   : > { %v1387_v41 = vsel %vm756_vm1, %v1384_v23, %v1386_v33  ;;  %v1450_v42 = vadd.f32 %v1385_v32, %v1208_v30  ;;  %v1809_v43 = vmul.f32 %v2766_v58, %v2817_v60  ;;  %v1810_v44 = vmul.f32 %v2766_v58, %v348_v61 }
  0x40   : > { %v1451_v45 = vadd.f32 %v1387_v41, %v1209_v31  ;;  %v1693_v50 = vrot.slane %v1567_v34, 1  ;;  %v1695_v51 = vrot.slane %v1568_v35, 1  ;;  %v1934_v54 = vrot.slane %v1808_v38, 2 }
  0x41   : > { %v1517_v4 = vadd.f32 %v1485_v24, %v1450_v42  ;;  %v1935_v62 = vrot.slane %v1809_v43, 2  ;;  %v1937_v63 = vrot.slane %v1810_v44, 2  ;;  %v2883_v59 = vunpack.c.l.bf16 %v2394_v39 }
  0x42   : > { %v1518_v5 = vadd.f32 %v1486_v28, %v1451_v45  ;;  %v1694_v6 = vsel %vm513_vm0, %v1692_v37, %v1693_v50  ;;  %v1696_v9 = vsel %vm513_vm0, %v1693_v50, %v1695_v51  ;;  %v2887_v60 = vunpack.c.h.bf16 %v2394_v39 }
  0x43   : > { %v1759_v47 = vadd.f32 %v1694_v6, %v1517_v4  ;;  %v1936_v61 = vsel %vm756_vm1, %v1934_v54, %v1935_v62  ;;  %v1938_v10 = vsel %vm756_vm1, %v1935_v62, %v1937_v63  ;;  %v2891_v11 = vunpack.c.l.bf16 %v261_v55 }
  0x44   : > { %v1760_v19 = vadd.f32 %v1696_v9, %v1518_v5  ;;  %v363_v20 = vmul.f32 %v2659_v0, %v2883_v59  ;;  %v364_v21 = vmul.f32 %v2659_v0, %v2887_v60  ;;  %v435_v23 = vmul.f32 %v2664_v1, %v2883_v59 }
  0x45   : > { %v2001_v24 = vadd.f32 %v1936_v61, %v1759_v47  ;;  %v436_v25 = vmul.f32 %v2664_v1, %v2887_v60  ;;  %v437_v26 = vmul.f32 %v2664_v1, %v2891_v11  ;;  %v678_v28 = vmul.f32 %v2674_v2, %v2883_v59 }
  0x46   : > { %v2002_v29 = vadd.f32 %v1938_v10, %v1760_v19  ;;  %v544_v30 = vrot.slane %v435_v23, 1  ;;  %v679_v31 = vmul.f32 %v2674_v2, %v2887_v60  ;;  %v680_v32 = vmul.f32 %v2674_v2, %v2891_v11 }
  0x47   : > { %v2037_v33 = vadd.f32 %v2811_v56, %v2001_v24  ;;  %v545_v34 = vrot.slane %v436_v25, 1  ;;  %v547_v35 = vrot.slane %v437_v26, 1  ;;  %v787_v37 = vrot.slane %v678_v28, 2 }
  0x48   : > { %v2038_v38 = vadd.f32 %v2811_v56, %v2002_v29  ;;  %v788_v39 = vrot.slane %v679_v31, 2  ;;  %v790_v41 = vrot.slane %v680_v32, 2  ;;  %v916_v42 = vmul.f32 %v2679_v3, %v2691_v12 }
  0x49   : > { %vm2069_vm5 = vcmp.gt.f32.partialorder %v2037_v33, 0.0  ;;  %v2101_v43 = vmul.f32 0.01, %v2037_v33  ;;  %v546_v44 = vsel %vm513_vm0, %v544_v30, %v545_v34  ;;  %v548_v45 = vsel %vm513_vm0, %v545_v34, %v547_v35 }
  0x4a   : > { %vm2070_vm6 = vcmp.gt.f32.partialorder %v2038_v38, 0.0  ;;  %v2102_v50 = vmul.f32 0.01, %v2038_v38  ;;  %v638_v51 = vadd.f32 %v546_v44, %v363_v20  ;;  %v639_v54 = vadd.f32 %v548_v45, %v364_v21  ;;  %v2398_v45 = vld [vmem:[%s2669_s15 + $0xa8] sm:$0xff]  }
  0x4b   : > { %v2133_v55 = vsel %vm2069_vm5, %v2037_v33, %v2101_v43  ;;  %v789_v4 = vsel %vm756_vm1, %v787_v37, %v788_v39  ;;  %v791_v62 = vsel %vm756_vm1, %v788_v39, %v790_v41  ;;  %v917_v63 = vmul.f32 %v2679_v3, %v2693_v13 }
  0x4c   : > { %v2134_v5 = vsel %vm2070_vm6, %v2038_v38, %v2102_v50  ;;  %v881_v6 = vadd.f32 %v789_v4, %v638_v51  ;;  %v882_v9 = vadd.f32 %v791_v62, %v639_v54  ;;  %v988_v47 = vmul.f32 %v2714_v22, %v2691_v12 }
  0x4d   : > { %v2150_v61 = vpack.c.bf16 %v2134_v5, %v2133_v55  ;;  %v989_v10 = vmul.f32 %v2714_v22, %v2693_v13  ;;  %v990_v19 = vmul.f32 %v2714_v22, %v2695_v14  ;;  %v1230_v20 = vmul.f32 %v2727_v27, %v2691_v12 }
  0x4e   : > { %v948_v21 = vadd.f32 %v916_v42, %v881_v6  ;;  %v949_v23 = vadd.f32 %v917_v63, %v882_v9  ;;  %v1096_v24 = vrot.slane %v988_v47, 1  ;;  %v1231_v25 = vmul.f32 %v2727_v27, %v2693_v13  ;;  %v285_v6 = vld [vmem:[%s2669_s15 + $0xb0] sm:$0x1] }
  0x4f   : > { %v2208_v26 = vsel %vm2158_vm2, %v2150_v61, 0  ;;  %v1097_v28 = vrot.slane %v989_v10, 1  ;;  %v1099_v29 = vrot.slane %v990_v19, 1  ;;  %v1232_v30 = vmul.f32 %v2727_v27, %v2695_v14 }
  0x50   : > { %2223 = vmatpush.bf16.xpose.msra.mxu1 %v2208_v26  ;;  %v1338_v31 = vrot.slane %v1230_v20, 2  ;;  %v1339_v32 = vrot.slane %v1231_v25, 2  ;;  %v1467_v33 = vmul.f32 %v2744_v40, %v2684_v7  ;;  %v1468_v34 = vmul.f32 %v2744_v40, %v2686_v8 }
  0x51   : > { %v1098_v35 = vsel %vm513_vm0, %v1096_v24, %v1097_v28  ;;  %v1100_v37 = vsel %vm513_vm0, %v1097_v28, %v1099_v29  ;;  %v1341_v38 = vrot.slane %v1232_v30, 2  ;;  %v1539_v39 = vmul.f32 %v2755_v49, %v2684_v7 }
  0x52   : > { %v1190_v41 = vadd.f32 %v1098_v35, %v948_v21  ;;  %v1191_v42 = vadd.f32 %v1100_v37, %v949_v23  ;;  %v1340_v43 = vsel %vm756_vm1, %v1338_v31, %v1339_v32  ;;  %v1540_v44 = vmul.f32 %v2755_v49, %v2686_v8 }
  0x53   : > { %v1342_v50 = vsel %vm756_vm1, %v1339_v32, %v1341_v38  ;;  %v1541_v51 = vmul.f32 %v2755_v49, %v2697_v15  ;;  %v1647_v54 = vrot.slane %v1539_v39, 1  ;;  %v1781_v55 = vmul.f32 %v2766_v58, %v2684_v7 }
  0x54   : > { %v1432_v4 = vadd.f32 %v1340_v43, %v1190_v41  ;;  %v1433_v62 = vadd.f32 %v1342_v50, %v1191_v42  ;;  %v1648_v63 = vrot.slane %v1540_v44, 1  ;;  %v1782_v5 = vmul.f32 %v2766_v58, %v2686_v8 }
  0x55   : > { %v1650_v9 = vrot.slane %v1541_v51, 1  ;;  %v1783_v47 = vmul.f32 %v2766_v58, %v2697_v15  ;;  %v1889_v61 = vrot.slane %v1781_v55, 2  ;;  %v2954_v10 = vunpack.c.l.bf16 %v2398_v45 }
  0x56   : > { %v1499_v19 = vadd.f32 %v1467_v33, %v1432_v4  ;;  %v1500_v20 = vadd.f32 %v1468_v34, %v1433_v62  ;;  %v1649_v21 = vsel %vm513_vm0, %v1647_v54, %v1648_v63  ;;  %v1890_v23 = vrot.slane %v1782_v5, 2 }
  0x57   : > { %v1651_v24 = vsel %vm513_vm0, %v1648_v63, %v1650_v9  ;;  %v1892_v25 = vrot.slane %v1783_v47, 2  ;;  %v2958_v26 = vunpack.c.h.bf16 %v2398_v45  ;;  %v2960_v28 = vunpack.c.l.bf16 %v285_v6 }
  0x58   : > { %v1741_v29 = vadd.f32 %v1649_v21, %v1499_v19  ;;  %v1742_v30 = vadd.f32 %v1651_v24, %v1500_v20  ;;  %v1891_v31 = vsel %vm756_vm1, %v1889_v61, %v1890_v23  ;;  %v379_v32 = vmul.f32 %v2659_v0, %v2954_v10 }
  0x59   : > { %v1893_v33 = vsel %vm756_vm1, %v1890_v23, %v1892_v25  ;;  %v380_v34 = vmul.f32 %v2659_v0, %v2958_v26  ;;  %v459_v35 = vmul.f32 %v2664_v1, %v2954_v10  ;;  %v460_v37 = vmul.f32 %v2664_v1, %v2958_v26 }
  0x5a   : > { %v1983_v38 = vadd.f32 %v1891_v31, %v1741_v29  ;;  %v1984_v39 = vadd.f32 %v1893_v33, %v1742_v30  ;;  %v461_v41 = vmul.f32 %v2664_v1, %v2960_v28  ;;  %v702_v42 = vmul.f32 %v2674_v2, %v2954_v10 }
  0x5b   : > { %v584_v43 = vrot.slane %v459_v35, 1  ;;  %v585_v44 = vrot.slane %v460_v37, 1  ;;  %v703_v45 = vmul.f32 %v2674_v2, %v2958_v26  ;;  %v704_v50 = vmul.f32 %v2674_v2, %v2960_v28 }
  0x5c   : > { %v2019_v51 = vadd.f32 %v2811_v56, %v1983_v38  ;;  %v2020_v54 = vadd.f32 %v2811_v56, %v1984_v39  ;;  %v587_v55 = vrot.slane %v461_v41, 1  ;;  %v827_v4 = vrot.slane %v702_v42, 2 }
  0x5d   : > { %v586_v62 = vsel %vm513_vm0, %v584_v43, %v585_v44  ;;  %v828_v63 = vrot.slane %v703_v45, 2  ;;  %v830_v5 = vrot.slane %v704_v50, 2  ;;  %v932_v6 = vmul.f32 %v2679_v3, %v2800_v48 }
  0x5e   : > { %vm2051_vm7 = vcmp.gt.f32.partialorder %v2019_v51, 0.0  ;;  %vm2052_vm8 = vcmp.gt.f32.partialorder %v2020_v54, 0.0  ;;  %v2083_v9 = vmul.f32 0.01, %v2019_v51  ;;  %v2084_v47 = vmul.f32 0.01, %v2020_v54 }
  0x5f   : > { %v588_v61 = vsel %vm513_vm0, %v585_v44, %v587_v55  ;;  %v654_v19 = vadd.f32 %v586_v62, %v379_v32  ;;  %v829_v20 = vsel %vm756_vm1, %v827_v4, %v828_v63  ;;  %v831_v21 = vsel %vm756_vm1, %v828_v63, %v830_v5 }
  0x60   : > { %v2115_v23 = vsel %vm2051_vm7, %v2019_v51, %v2083_v9  ;;  %v2116_v24 = vsel %vm2052_vm8, %v2020_v54, %v2084_v47  ;;  %v655_v25 = vadd.f32 %v588_v61, %v380_v34  ;;  %v933_v29 = vmul.f32 %v2679_v3, %v2804_v52 }
  0x61   : > { %v2141_v30 = vpack.c.bf16 %v2116_v24, %v2115_v23  ;;  %v897_v31 = vadd.f32 %v829_v20, %v654_v19  ;;  %v1012_v33 = vmul.f32 %v2714_v22, %v2800_v48  ;;  %v1013_v35 = vmul.f32 %v2714_v22, %v2804_v52 }
  0x62   : > { %v898_v37 = vadd.f32 %v831_v21, %v655_v25  ;;  %v1014_v32 = vmul.f32 %v2714_v22, %v2806_v53  ;;  %v1254_v38 = vmul.f32 %v2727_v27, %v2800_v48  ;;  %v1255_v34 = vmul.f32 %v2727_v27, %v2804_v52  ;;  %v256_v21 = vld [vmem:[%s2669_s15 + $0x3c] sm:$0xff]  }
  0x63   : > { %v2181_v39 = vsel %vm2158_vm2, %v2141_v30, 0  ;;  %v964_v41 = vadd.f32 %v932_v6, %v897_v31  ;;  %v1136_v42 = vrot.slane %v1012_v33, 1  ;;  %v1137_v43 = vrot.slane %v1013_v35, 1 }
  0x64   : > { %2211 = vmatpush.bf16.xpose.msra.mxu0 %v2181_v39  ;;  %v965_v44 = vadd.f32 %v933_v29, %v898_v37  ;;  %v1139_v45 = vrot.slane %v1014_v32, 1  ;;  %v1256_v50 = vmul.f32 %v2727_v27, %v2806_v53  ;;  %v1378_v51 = vrot.slane %v1254_v38, 2  ;;  %v258_v37 = vld [vmem:[%s2669_s15 + $0x44] sm:$0x1] }
  0x65   : > { %v1138_v54 = vsel %vm513_vm0, %v1136_v42, %v1137_v43  ;;  %v1379_v55 = vrot.slane %v1255_v34, 2  ;;  %v1483_v4 = vmul.f32 %v2744_v40, %v2789_v36  ;;  %v1484_v62 = vmul.f32 %v2744_v40, %v2795_v46 }
  0x66   : > { %v1140_v63 = vsel %vm513_vm0, %v1137_v43, %v1139_v45  ;;  %v1206_v5 = vadd.f32 %v1138_v54, %v964_v41  ;;  %v1381_v6 = vrot.slane %v1256_v50, 2  ;;  %v1563_v9 = vmul.f32 %v2755_v49, %v2789_v36 }
  0x67   : > { %v1207_v47 = vadd.f32 %v1140_v63, %v965_v44  ;;  %v1380_v61 = vsel %vm756_vm1, %v1378_v51, %v1379_v55  ;;  %v1564_v19 = vmul.f32 %v2755_v49, %v2795_v46  ;;  %v1565_v20 = vmul.f32 %v2755_v49, %v2813_v57 }
  0x68   : > { %v1382_v23 = vsel %vm756_vm1, %v1379_v55, %v1381_v6  ;;  %v1448_v24 = vadd.f32 %v1380_v61, %v1206_v5  ;;  %v1687_v25 = vrot.slane %v1563_v9, 1  ;;  %v1805_v29 = vmul.f32 %v2766_v58, %v2789_v36 }
  0x69   : > { %v1449_v30 = vadd.f32 %v1382_v23, %v1207_v47  ;;  %v1688_v31 = vrot.slane %v1564_v19, 1  ;;  %v1690_v33 = vrot.slane %v1565_v20, 1  ;;  %v1806_v35 = vmul.f32 %v2766_v58, %v2795_v46 }
  0x6a   : > { %v1515_v32 = vadd.f32 %v1483_v4, %v1448_v24  ;;  %v1807_v38 = vmul.f32 %v2766_v58, %v2813_v57  ;;  %v1929_v34 = vrot.slane %v1805_v29, 2  ;;  %v3025_v39 = vunpack.c.l.bf16 %v256_v21 }
  0x6b   : > { %v1516_v41 = vadd.f32 %v1484_v62, %v1449_v30  ;;  %v1689_v42 = vsel %vm513_vm0, %v1687_v25, %v1688_v31  ;;  %v1691_v43 = vsel %vm513_vm0, %v1688_v31, %v1690_v33  ;;  %v1930_v36 = vrot.slane %v1806_v35, 2 }
  0x6c   : > { %v1757_v44 = vadd.f32 %v1689_v42, %v1515_v32  ;;  %v1932_v45 = vrot.slane %v1807_v38, 2  ;;  %v3029_v50 = vunpack.c.h.bf16 %v256_v21  ;;  %v3031_v51 = vunpack.c.l.bf16 %v258_v37 }
  0x6d   : > { %v1758_v46 = vadd.f32 %v1691_v43, %v1516_v41  ;;  %v1931_v54 = vsel %vm756_vm1, %v1929_v34, %v1930_v36  ;;  %v361_v57 = vmul.f32 %v2659_v0, %v3025_v39  ;;  %v432_v55 = vmul.f32 %v2664_v1, %v3025_v39 }
  0x6e   : > { %v1933_v4 = vsel %vm756_vm1, %v1930_v36, %v1932_v45  ;;  %v1999_v62 = vadd.f32 %v1931_v54, %v1757_v44  ;;  %v362_v63 = vmul.f32 %v2659_v0, %v3029_v50  ;;  %v433_v5 = vmul.f32 %v2664_v1, %v3029_v50 }
  0x6f   : > { %v2000_v6 = vadd.f32 %v1933_v4, %v1758_v46  ;;  %v434_v9 = vmul.f32 %v2664_v1, %v3031_v51  ;;  %v539_v47 = vrot.slane %v432_v55, 1  ;;  %v675_v61 = vmul.f32 %v2674_v2, %v3025_v39 }
  0x70   : > { %v2035_v19 = vadd.f32 %v2811_v56, %v1999_v62  ;;  %v540_v20 = vrot.slane %v433_v5, 1  ;;  %v676_v21 = vmul.f32 %v2674_v2, %v3029_v50  ;;  %v677_v23 = vmul.f32 %v2674_v2, %v3031_v51 }
  0x71   : > { %v2036_v24 = vadd.f32 %v2811_v56, %v2000_v6  ;;  %v542_v25 = vrot.slane %v434_v9, 1  ;;  %v782_v29 = vrot.slane %v675_v61, 2  ;;  %v914_v30 = vmul.f32 %v2679_v3, %v2883_v59 }
  0x72   : > { %vm2067_vm9 = vcmp.gt.f32.partialorder %v2035_v19, 0.0  ;;  %v2099_v31 = vmul.f32 0.01, %v2035_v19  ;;  %v541_v33 = vsel %vm513_vm0, %v539_v47, %v540_v20  ;;  %v783_v35 = vrot.slane %v676_v21, 2 }
  0x73   : > { %vm2068_vm10 = vcmp.gt.f32.partialorder %v2036_v24, 0.0  ;;  %v2100_v37 = vmul.f32 0.01, %v2036_v24  ;;  %v543_v32 = vsel %vm513_vm0, %v540_v20, %v542_v25  ;;  %v636_v38 = vadd.f32 %v541_v33, %v361_v57 }
  0x74   : > { %v2131_v34 = vsel %vm2067_vm9, %v2035_v19, %v2099_v31  ;;  %v637_v41 = vadd.f32 %v543_v32, %v362_v63  ;;  %v784_v42 = vsel %vm756_vm1, %v782_v29, %v783_v35  ;;  %v785_v43 = vrot.slane %v677_v23, 2 }
  0x75   : > { %v2132_v36 = vsel %vm2068_vm10, %v2036_v24, %v2100_v37  ;;  %v879_v44 = vadd.f32 %v784_v42, %v636_v38  ;;  %v915_v45 = vmul.f32 %v2679_v3, %v2887_v60  ;;  %v985_v46 = vmul.f32 %v2714_v22, %v2883_v59 }
  0x76   : > { %v2149_v54 = vpack.c.bf16 %v2132_v36, %v2131_v34  ;;  %v786_v55 = vsel %vm756_vm1, %v783_v35, %v785_v43  ;;  %v986_v4 = vmul.f32 %v2714_v22, %v2887_v60  ;;  %v987_v57 = vmul.f32 %v2714_v22, %v2891_v11  ;;  %v280_v43 = vld [vmem:[%s2669_s15 + $0x9c] sm:$0xff]  }
  0x77   : > { %v880_v62 = vadd.f32 %v786_v55, %v637_v41  ;;  %v946_v63 = vadd.f32 %v914_v30, %v879_v44  ;;  %v1091_v5 = vrot.slane %v985_v46, 1  ;;  %v1227_v6 = vmul.f32 %v2727_v27, %v2883_v59 }
  0x78   : > { %v2205_v9 = vsel %vm2158_vm2, %v2149_v54, 0  ;;  %v1092_v47 = vrot.slane %v986_v4, 1  ;;  %v1094_v61 = vrot.slane %v987_v57, 1  ;;  %v1228_v19 = vmul.f32 %v2727_v27, %v2887_v60 }
  0x79   : > { %2224 = vmatpush.bf16.xpose.msra.mxu1 %v2205_v9  ;;  %v947_v20 = vadd.f32 %v915_v45, %v880_v62  ;;  %v1229_v21 = vmul.f32 %v2727_v27, %v2891_v11  ;;  %v1333_v23 = vrot.slane %v1227_v6, 2  ;;  %v1465_v24 = vmul.f32 %v2744_v40, %v2691_v12  ;;  %v282_v62 = vld [vmem:[%s2669_s15 + $0xa4] sm:$0x1] }
  0x7a   : > { %v1093_v25 = vsel %vm513_vm0, %v1091_v5, %v1092_v47  ;;  %v1095_v29 = vsel %vm513_vm0, %v1092_v47, %v1094_v61  ;;  %v1334_v30 = vrot.slane %v1228_v19, 2  ;;  %v1466_v31 = vmul.f32 %v2744_v40, %v2693_v13 }
  0x7b   : > { %v1188_v33 = vadd.f32 %v1093_v25, %v946_v63  ;;  %v1189_v35 = vadd.f32 %v1095_v29, %v947_v20  ;;  %v1336_v37 = vrot.slane %v1229_v21, 2  ;;  %v1536_v32 = vmul.f32 %v2755_v49, %v2691_v12 }
  0x7c   : > { %v1335_v38 = vsel %vm756_vm1, %v1333_v23, %v1334_v30  ;;  %v1537_v34 = vmul.f32 %v2755_v49, %v2693_v13  ;;  %v1538_v41 = vmul.f32 %v2755_v49, %v2695_v14  ;;  %v1778_v42 = vmul.f32 %v2766_v58, %v2691_v12 }
  0x7d   : > { %v1337_v36 = vsel %vm756_vm1, %v1334_v30, %v1336_v37  ;;  %v1430_v44 = vadd.f32 %v1335_v38, %v1188_v33  ;;  %v1642_v45 = vrot.slane %v1536_v32, 1  ;;  %v1779_v46 = vmul.f32 %v2766_v58, %v2693_v13 }
  0x7e   : > { %v1431_v54 = vadd.f32 %v1337_v36, %v1189_v35  ;;  %v1643_v55 = vrot.slane %v1537_v34, 1  ;;  %v1645_v4 = vrot.slane %v1538_v41, 1  ;;  %v1780_v57 = vmul.f32 %v2766_v58, %v2695_v14 }
  0x7f   : > { %v1497_v63 = vadd.f32 %v1465_v24, %v1430_v44  ;;  %v1884_v5 = vrot.slane %v1778_v42, 2  ;;  %v1885_v6 = vrot.slane %v1779_v46, 2  ;;  %v3096_v9 = vunpack.c.l.bf16 %v280_v43 }
  0x80   : > { %v1498_v12 = vadd.f32 %v1466_v31, %v1431_v54  ;;  %v1644_v47 = vsel %vm513_vm0, %v1642_v45, %v1643_v55  ;;  %v1646_v61 = vsel %vm513_vm0, %v1643_v55, %v1645_v4  ;;  %v1887_v19 = vrot.slane %v1780_v57, 2 }
  0x81   : > { %v1739_v20 = vadd.f32 %v1644_v47, %v1497_v63  ;;  %v1886_v13 = vsel %vm756_vm1, %v1884_v5, %v1885_v6  ;;  %v3101_v21 = vunpack.c.h.bf16 %v280_v43  ;;  %v3103_v23 = vunpack.c.l.bf16 %v282_v62 }
  0x82   : > { %v1740_v14 = vadd.f32 %v1646_v61, %v1498_v12  ;;  %v1888_v24 = vsel %vm756_vm1, %v1885_v6, %v1887_v19  ;;  %v377_v25 = vmul.f32 %v2659_v0, %v3096_v9  ;;  %v456_v29 = vmul.f32 %v2664_v1, %v3096_v9 }
  0x83   : > { %v1981_v30 = vadd.f32 %v1886_v13, %v1739_v20  ;;  %v378_v31 = vmul.f32 %v2659_v0, %v3101_v21  ;;  %v457_v33 = vmul.f32 %v2664_v1, %v3101_v21  ;;  %v458_v35 = vmul.f32 %v2664_v1, %v3103_v23 }
  0x84   : > { %v1982_v37 = vadd.f32 %v1888_v24, %v1740_v14  ;;  %v579_v32 = vrot.slane %v456_v29, 1  ;;  %v699_v38 = vmul.f32 %v2674_v2, %v3096_v9  ;;  %v700_v34 = vmul.f32 %v2674_v2, %v3101_v21 }
  0x85   : > { %v2017_v41 = vadd.f32 %v2811_v56, %v1981_v30  ;;  %v580_v42 = vrot.slane %v457_v33, 1  ;;  %v582_v43 = vrot.slane %v458_v35, 1  ;;  %v701_v0 = vmul.f32 %v2674_v2, %v3103_v23 }
  0x86   : > { %v2018_v36 = vadd.f32 %v2811_v56, %v1982_v37  ;;  %v822_v44 = vrot.slane %v699_v38, 2  ;;  %v823_v45 = vrot.slane %v700_v34, 2  ;;  %v930_v1 = vmul.f32 %v2679_v3, %v2954_v10 }
  0x87   : > { %vm2049_vm11 = vcmp.gt.f32.partialorder %v2017_v41, 0.0  ;;  %v2081_v46 = vmul.f32 0.01, %v2017_v41  ;;  %v581_v54 = vsel %vm513_vm0, %v579_v32, %v580_v42  ;;  %v583_v55 = vsel %vm513_vm0, %v580_v42, %v582_v43 }
  0x88   : > { %vm2050_vm12 = vcmp.gt.f32.partialorder %v2018_v36, 0.0  ;;  %v2082_v4 = vmul.f32 0.01, %v2018_v36  ;;  %v652_v57 = vadd.f32 %v581_v54, %v377_v25  ;;  %v653_v62 = vadd.f32 %v583_v55, %v378_v31 }
  0x89   : > { %v2113_v63 = vsel %vm2049_vm11, %v2017_v41, %v2081_v46  ;;  %v824_v2 = vsel %vm756_vm1, %v822_v44, %v823_v45  ;;  %v825_v5 = vrot.slane %v701_v0, 2  ;;  %v931_v6 = vmul.f32 %v2679_v3, %v2958_v26 }
  0x8a   : > { %v2114_v12 = vsel %vm2050_vm12, %v2018_v36, %v2082_v4  ;;  %v895_v47 = vadd.f32 %v824_v2, %v652_v57  ;;  %v1009_v61 = vmul.f32 %v2714_v22, %v2954_v10  ;;  %v1010_v19 = vmul.f32 %v2714_v22, %v2958_v26  ;;  %v2393_v4 = vld [vmem:[%s2669_s15 + $0x30] sm:$0xff]  }
  0x8b   : > { %v2140_v20 = vpack.c.bf16 %v2114_v12, %v2113_v63  ;;  %v826_v13 = vsel %vm756_vm1, %v823_v45, %v825_v5  ;;  %v1011_v14 = vmul.f32 %v2714_v22, %v2960_v28  ;;  %v1251_v24 = vmul.f32 %v2727_v27, %v2954_v10 }
  0x8c   : > { %v896_v25 = vadd.f32 %v826_v13, %v653_v62  ;;  %v962_v29 = vadd.f32 %v930_v1, %v895_v47  ;;  %v1131_v3 = vrot.slane %v1009_v61, 1  ;;  %v1132_v30 = vrot.slane %v1010_v19, 1  ;;  %v255_v47 = vld [vmem:[%s2669_s15 + $0x38] sm:$0x1] }
  0x8d   : > { %v2178_v31 = vsel %vm2158_vm2, %v2140_v20, 0  ;;  %v1134_v33 = vrot.slane %v1011_v14, 1  ;;  %v1252_v35 = vmul.f32 %v2727_v27, %v2958_v26  ;;  %v1253_v37 = vmul.f32 %v2727_v27, %v2960_v28 }
  0x8e   : > { %2212 = vmatpush.bf16.xpose.msra.mxu0 %v2178_v31  ;;  %v963_v32 = vadd.f32 %v931_v6, %v896_v25  ;;  %v1133_v22 = vsel %vm513_vm0, %v1131_v3, %v1132_v30  ;;  %v1373_v38 = vrot.slane %v1251_v24, 2  ;;  %v1481_v34 = vmul.f32 %v2744_v40, %v2800_v48 }
  0x8f   : > { %v1135_v41 = vsel %vm513_vm0, %v1132_v30, %v1134_v33  ;;  %v1204_v42 = vadd.f32 %v1133_v22, %v962_v29  ;;  %v1374_v43 = vrot.slane %v1252_v35, 2  ;;  %v1376_v0 = vrot.slane %v1253_v37, 2  ;;  %v3189_v33 = vld [vmem:[%s3998_s1 + $0x1] ss:$0 sm:$0xff] }
  0x90   : > { %v1205_v36 = vadd.f32 %v1135_v41, %v963_v32  ;;  %v1482_v44 = vmul.f32 %v2744_v40, %v2804_v52  ;;  %v1560_v27 = vmul.f32 %v2755_v49, %v2800_v48  ;;  %v1561_v45 = vmul.f32 %v2755_v49, %v2804_v52  ;;  %v3200_v41 = vld [vmem:[%s3998_s1 + $0x2] ss:$0 sm:$0xff] }
  0x91   : > { %v1375_v1 = vsel %vm756_vm1, %v1373_v38, %v1374_v43  ;;  %v1377_v46 = vsel %vm756_vm1, %v1374_v43, %v1376_v0  ;;  %v1562_v54 = vmul.f32 %v2755_v49, %v2806_v53  ;;  %v1802_v55 = vmul.f32 %v2766_v58, %v2800_v48 }
  0x92   : > { %v1446_v57 = vadd.f32 %v1375_v1, %v1204_v42  ;;  %v1447_v40 = vadd.f32 %v1377_v46, %v1205_v36  ;;  %v1682_v62 = vrot.slane %v1560_v27, 1  ;;  %v1683_v63 = vrot.slane %v1561_v45, 1 }
  0x93   : > { %v1685_v2 = vrot.slane %v1562_v54, 1  ;;  %v1803_v5 = vmul.f32 %v2766_v58, %v2804_v52  ;;  %v1804_v6 = vmul.f32 %v2766_v58, %v2806_v53  ;;  %v1924_v12 = vrot.slane %v1802_v55, 2  ;;  %v3178_v58 = vld [vmem:[%s3998_s1] ss:$0 sm:$0xff]  ;;  %v3213_v55 = vld [vmem:[%s3998_s1 + $0x4] ss:$0 sm:$0xff] }
  0x94   : > { %v1513_v61 = vadd.f32 %v1481_v34, %v1446_v57  ;;  %v1514_v19 = vadd.f32 %v1482_v44, %v1447_v40  ;;  %v1684_v49 = vsel %vm513_vm0, %v1682_v62, %v1683_v63  ;;  %v3168_v20 = vunpack.c.l.bf16 %v2393_v4 }
  0x95   : > { %v1686_v48 = vsel %vm513_vm0, %v1683_v63, %v1685_v2  ;;  %v1925_v13 = vrot.slane %v1803_v5, 2  ;;  %v1927_v14 = vrot.slane %v1804_v6, 2  ;;  %v3171_v24 = vunpack.c.h.bf16 %v2393_v4 }
  0x96   : > { %v1755_v25 = vadd.f32 %v1684_v49, %v1513_v61  ;;  %v1756_v29 = vadd.f32 %v1686_v48, %v1514_v19  ;;  %v3173_v52 = vunpack.c.l.bf16 %v255_v47  ;;  %v359_v53 = vmul.f32 %v3178_v58, %v3168_v20  ;;  %v3226_v49 = vld [vmem:[%s3998_s1 + $0x5] ss:$0 sm:$0xff] }
  0x97   : > { %v1926_v3 = vsel %vm756_vm1, %v1924_v12, %v1925_v13  ;;  %v1928_v30 = vsel %vm756_vm1, %v1925_v13, %v1927_v14  ;;  %v360_v31 = vmul.f32 %v3178_v58, %v3171_v24  ;;  %v429_v35 = vmul.f32 %v3189_v33, %v3168_v20 }
  0x98   : > { %v1997_v37 = vadd.f32 %v1926_v3, %v1755_v25  ;;  %v1998_v32 = vadd.f32 %v1928_v30, %v1756_v29  ;;  %v430_v22 = vmul.f32 %v3189_v33, %v3171_v24  ;;  %v431_v38 = vmul.f32 %v3189_v33, %v3173_v52 }
  0x99   : > { %v534_v34 = vrot.slane %v429_v35, 1  ;;  %v672_v42 = vmul.f32 %v3200_v41, %v3168_v20  ;;  %v673_v43 = vmul.f32 %v3200_v41, %v3171_v24  ;;  %v674_v0 = vmul.f32 %v3200_v41, %v3173_v52 }
  0x9a   : > { %v2033_v36 = vadd.f32 %v2811_v56, %v1997_v37  ;;  %v2034_v44 = vadd.f32 %v2811_v56, %v1998_v32  ;;  %v535_v27 = vrot.slane %v430_v22, 1  ;;  %v537_v45 = vrot.slane %v431_v38, 1 }
  0x9b   : > { %v777_v1 = vrot.slane %v672_v42, 2  ;;  %v778_v46 = vrot.slane %v673_v43, 2  ;;  %v780_v54 = vrot.slane %v674_v0, 2  ;;  %v912_v4 = vmul.f32 %v3213_v55, %v3025_v39 }
  0x9c   : > { %vm2065_vm13 = vcmp.gt.f32.partialorder %v2033_v36, 0.0  ;;  %vm2066_vm14 = vcmp.gt.f32.partialorder %v2034_v44, 0.0  ;;  %v2097_v57 = vmul.f32 0.01, %v2033_v36  ;;  %v2098_v40 = vmul.f32 0.01, %v2034_v44 }
  0x9d   : > { %v536_v62 = vsel %vm513_vm0, %v534_v34, %v535_v27  ;;  %v538_v56 = vsel %vm513_vm0, %v535_v27, %v537_v45  ;;  %v779_v63 = vsel %vm756_vm1, %v777_v1, %v778_v46  ;;  %v781_v2 = vsel %vm756_vm1, %v778_v46, %v780_v54 }
  0x9e   : > { %v2129_v5 = vsel %vm2065_vm13, %v2033_v36, %v2097_v57  ;;  %v2130_v6 = vsel %vm2066_vm14, %v2034_v44, %v2098_v40  ;;  %v634_v12 = vadd.f32 %v536_v62, %v359_v53  ;;  %v635_v47 = vadd.f32 %v538_v56, %v360_v31  ;;  %v3237_v53 = vld [vmem:[%s3998_s1 + $0x6] ss:$0 sm:$0xff]  ;;  %v3250_v36 = vld [vmem:[%s3998_s1 + $0x8] ss:$0 sm:$0xff]  ;;  %v3261_v57 = vld [vmem:[%s3998_s1 + $0x9] ss:$0 sm:$0xff] }
  0x9f   : > { %v2148_v61 = vpack.c.bf16 %v2130_v6, %v2129_v5  ;;  %v913_v19 = vmul.f32 %v3213_v55, %v3029_v50  ;;  %v982_v48 = vmul.f32 %v3226_v49, %v3025_v39  ;;  %v983_v13 = vmul.f32 %v3226_v49, %v3029_v50  ;;  %v3273_v5 = vld [vmem:[%s3998_s1 + $0xa] ss:$0 sm:$0xff] }
  0xa0   : > { %v877_v14 = vadd.f32 %v779_v63, %v634_v12  ;;  %v878_v25 = vadd.f32 %v781_v2, %v635_v47  ;;  %v984_v29 = vmul.f32 %v3226_v49, %v3031_v51  ;;  %v1224_v3 = vmul.f32 %v3237_v53, %v3025_v39  ;;  %v2397_v12 = vld [vmem:[%s2669_s15 + $0x90] sm:$0xff]  }
  0xa1   : > { %v2202_v30 = vsel %vm2158_vm2, %v2148_v61, 0  ;;  %v1086_v31 = vrot.slane %v982_v48, 1  ;;  %v1087_v35 = vrot.slane %v983_v13, 1  ;;  %v1225_v37 = vmul.f32 %v3237_v53, %v3029_v50 }
  0xa2   : > { %2225 = vmatpush.bf16.xpose.msra.mxu1 %v2202_v30  ;;  %v944_v32 = vadd.f32 %v912_v4, %v877_v14  ;;  %v945_v22 = vadd.f32 %v913_v19, %v878_v25  ;;  %v1089_v38 = vrot.slane %v984_v29, 1  ;;  %v1226_v34 = vmul.f32 %v3237_v53, %v3031_v51 }
  0xa3   : > { %v1088_v42 = vsel %vm513_vm0, %v1086_v31, %v1087_v35  ;;  %v1328_v43 = vrot.slane %v1224_v3, 2  ;;  %v1329_v0 = vrot.slane %v1225_v37, 2  ;;  %v1463_v44 = vmul.f32 %v3250_v36, %v2883_v59  ;;  %v279_v3 = vld [vmem:[%s2669_s15 + $0x98] sm:$0x1] }
  0xa4   : > { %v1090_v27 = vsel %vm513_vm0, %v1087_v35, %v1089_v38  ;;  %v1186_v45 = vadd.f32 %v1088_v42, %v944_v32  ;;  %v1331_v1 = vrot.slane %v1226_v34, 2  ;;  %v1464_v46 = vmul.f32 %v3250_v36, %v2887_v60 }
  0xa5   : > { %v1187_v54 = vadd.f32 %v1090_v27, %v945_v22  ;;  %v1330_v4 = vsel %vm756_vm1, %v1328_v43, %v1329_v0  ;;  %v1533_v40 = vmul.f32 %v3261_v57, %v2883_v59  ;;  %v1534_v62 = vmul.f32 %v3261_v57, %v2887_v60 }
  0xa6   : > { %v1332_v56 = vsel %vm756_vm1, %v1329_v0, %v1331_v1  ;;  %v1428_v63 = vadd.f32 %v1330_v4, %v1186_v45  ;;  %v1535_v2 = vmul.f32 %v3261_v57, %v2891_v11  ;;  %v1775_v6 = vmul.f32 %v3273_v5, %v2883_v59  ;;  %v3308_v4 = vld [vmem:[%s3999_s2] ss:$0 sm:$0xff] }
  0xa7   : > { %v1429_v47 = vadd.f32 %v1332_v56, %v1187_v54  ;;  %v1637_v61 = vrot.slane %v1533_v40, 1  ;;  %v1638_v19 = vrot.slane %v1534_v62, 1  ;;  %v1776_v48 = vmul.f32 %v3273_v5, %v2887_v60 }
  0xa8   : > { %v1495_v13 = vadd.f32 %v1463_v44, %v1428_v63  ;;  %v1640_v14 = vrot.slane %v1535_v2, 1  ;;  %v1777_v25 = vmul.f32 %v3273_v5, %v2891_v11  ;;  %v1879_v29 = vrot.slane %v1775_v6, 2 }
  0xa9   : > { %v1496_v30 = vadd.f32 %v1464_v46, %v1429_v47  ;;  %v1639_v31 = vsel %vm513_vm0, %v1637_v61, %v1638_v19  ;;  %v1880_v35 = vrot.slane %v1776_v48, 2  ;;  %v3284_v37 = vunpack.c.l.bf16 %v2397_v12 }
  0xaa   : > { %v1641_v59 = vsel %vm513_vm0, %v1638_v19, %v1640_v14  ;;  %v1737_v32 = vadd.f32 %v1639_v31, %v1495_v13  ;;  %v1882_v22 = vrot.slane %v1777_v25, 2  ;;  %v3287_v38 = vunpack.c.h.bf16 %v2397_v12 }
  0xab   : > { %v1738_v60 = vadd.f32 %v1641_v59, %v1496_v30  ;;  %v1881_v34 = vsel %vm756_vm1, %v1879_v29, %v1880_v35  ;;  %v3290_v42 = vunpack.c.l.bf16 %v279_v3  ;;  %v375_v11 = vmul.f32 %v3178_v58, %v3284_v37 }
  0xac   : > { %v1883_v43 = vsel %vm756_vm1, %v1880_v35, %v1882_v22  ;;  %v1979_v0 = vadd.f32 %v1881_v34, %v1737_v32  ;;  %v376_v44 = vmul.f32 %v3178_v58, %v3287_v38  ;;  %v453_v27 = vmul.f32 %v3189_v33, %v3284_v37 }
  0xad   : > { %v1980_v45 = vadd.f32 %v1883_v43, %v1738_v60  ;;  %v454_v1 = vmul.f32 %v3189_v33, %v3287_v38  ;;  %v455_v46 = vmul.f32 %v3189_v33, %v3290_v42  ;;  %v696_v54 = vmul.f32 %v3200_v41, %v3284_v37 }
  0xae   : > { %v2015_v40 = vadd.f32 %v3308_v4, %v1979_v0  ;;  %v574_v62 = vrot.slane %v453_v27, 1  ;;  %v697_v56 = vmul.f32 %v3200_v41, %v3287_v38  ;;  %v698_v63 = vmul.f32 %v3200_v41, %v3290_v42 }
  0xaf   : > { %v2016_v2 = vadd.f32 %v3308_v4, %v1980_v45  ;;  %v575_v6 = vrot.slane %v454_v1, 1  ;;  %v577_v12 = vrot.slane %v455_v46, 1  ;;  %v817_v47 = vrot.slane %v696_v54, 2 }
  0xb0   : > { %vm2047_vm15 = vcmp.gt.f32.partialorder %v2015_v40, 0.0  ;;  %v2079_v61 = vmul.f32 0.01, %v2015_v40  ;;  %v818_v19 = vrot.slane %v697_v56, 2  ;;  %v820_v48 = vrot.slane %v698_v63, 2 }
  0xb1   : > { %vm2048_vm3 = vcmp.gt.f32.partialorder %v2016_v2, 0.0  ;;  %v2080_v13 = vmul.f32 0.01, %v2016_v2  ;;  %v576_v14 = vsel %vm513_vm0, %v574_v62, %v575_v6  ;;  %v578_v25 = vsel %vm513_vm0, %v575_v6, %v577_v12 }
  0xb2   : > { %v2111_v29 = vsel %vm2047_vm15, %v2015_v40, %v2079_v61  ;;  %v650_v3 = vadd.f32 %v576_v14, %v375_v11  ;;  %v651_v30 = vadd.f32 %v578_v25, %v376_v44  ;;  %v819_v31 = vsel %vm756_vm1, %v817_v47, %v818_v19 }
  0xb3   : > { %v2112_v35 = vsel %vm2048_vm3, %v2016_v2, %v2080_v13  ;;  %v821_v59 = vsel %vm756_vm1, %v818_v19, %v820_v48  ;;  %v928_v32 = vmul.f32 %v3213_v55, %v3096_v9  ;;  %v929_v22 = vmul.f32 %v3213_v55, %v3101_v21 }
  0xb4   : > { %v2139_v60 = vpack.c.bf16 %v2112_v35, %v2111_v29  ;;  %v893_v34 = vadd.f32 %v819_v31, %v650_v3  ;;  %v894_v43 = vadd.f32 %v821_v59, %v651_v30  ;;  %v1006_v0 = vmul.f32 %v3226_v49, %v3096_v9  ;;  %v250_v31 = vld [vmem:[%s2669_s15 + $0x24] sm:$0xff]  }
  0xb5   : > { %v1007_v11 = vmul.f32 %v3226_v49, %v3101_v21  ;;  %v1008_v44 = vmul.f32 %v3226_v49, %v3103_v23  ;;  %v1248_v27 = vmul.f32 %v3237_v53, %v3096_v9  ;;  %v1249_v45 = vmul.f32 %v3237_v53, %v3101_v21 }
  0xb6   : > { %v2175_v1 = vsel %vm2158_vm2, %v2139_v60, 0  ;;  %v960_v46 = vadd.f32 %v928_v32, %v893_v34  ;;  %v961_v54 = vadd.f32 %v929_v22, %v894_v43  ;;  %v1126_v40 = vrot.slane %v1006_v0, 1 }
  0xb7   : > { %2213 = vmatpush.bf16.xpose.msra.mxu0 %v2175_v1  ;;  %v1127_v62 = vrot.slane %v1007_v11, 1  ;;  %v1129_v56 = vrot.slane %v1008_v44, 1  ;;  %v1250_v63 = vmul.f32 %v3237_v53, %v3103_v23  ;;  %v1368_v2 = vrot.slane %v1248_v27, 2  ;;  %v252_v11 = vld [vmem:[%s2669_s15 + $0x2c] sm:$0x1] }
  0xb8   : > { %v1369_v6 = vrot.slane %v1249_v45, 2  ;;  %v1479_v12 = vmul.f32 %v3250_v36, %v2954_v10  ;;  %v1480_v47 = vmul.f32 %v3250_v36, %v2958_v26  ;;  %v1557_v61 = vmul.f32 %v3261_v57, %v2954_v10 }
  0xb9   : > { %v1128_v19 = vsel %vm513_vm0, %v1126_v40, %v1127_v62  ;;  %v1130_v48 = vsel %vm513_vm0, %v1127_v62, %v1129_v56  ;;  %v1371_v13 = vrot.slane %v1250_v63, 2  ;;  %v1558_v14 = vmul.f32 %v3261_v57, %v2958_v26 }
  0xba   : > { %v1202_v25 = vadd.f32 %v1128_v19, %v960_v46  ;;  %v1203_v29 = vadd.f32 %v1130_v48, %v961_v54  ;;  %v1370_v3 = vsel %vm756_vm1, %v1368_v2, %v1369_v6  ;;  %v1559_v30 = vmul.f32 %v3261_v57, %v2960_v28 }
  0xbb   : > { %v1372_v35 = vsel %vm756_vm1, %v1369_v6, %v1371_v13  ;;  %v1677_v59 = vrot.slane %v1557_v61, 1  ;;  %v1678_v32 = vrot.slane %v1558_v14, 1  ;;  %v1799_v22 = vmul.f32 %v3273_v5, %v2954_v10 }
  0xbc   : > { %v1444_v60 = vadd.f32 %v1370_v3, %v1202_v25  ;;  %v1445_v34 = vadd.f32 %v1372_v35, %v1203_v29  ;;  %v1680_v43 = vrot.slane %v1559_v30, 1  ;;  %v1800_v0 = vmul.f32 %v3273_v5, %v2958_v26 }
  0xbd   : > { %v1679_v44 = vsel %vm513_vm0, %v1677_v59, %v1678_v32  ;;  %v1801_v27 = vmul.f32 %v3273_v5, %v2960_v28  ;;  %v1919_v45 = vrot.slane %v1799_v22, 2  ;;  %v3360_v1 = vunpack.c.l.bf16 %v250_v31 }
  0xbe   : > { %v1511_v46 = vadd.f32 %v1479_v12, %v1444_v60  ;;  %v1512_v54 = vadd.f32 %v1480_v47, %v1445_v34  ;;  %v1681_v40 = vsel %vm513_vm0, %v1678_v32, %v1680_v43  ;;  %v1920_v10 = vrot.slane %v1800_v0, 2 }
  0xbf   : > { %v1922_v62 = vrot.slane %v1801_v27, 2  ;;  %v3363_v56 = vunpack.c.h.bf16 %v250_v31  ;;  %v3365_v63 = vunpack.c.l.bf16 %v252_v11  ;;  %v357_v26 = vmul.f32 %v3178_v58, %v3360_v1 }
  0xc0   : > { %v1753_v2 = vadd.f32 %v1679_v44, %v1511_v46  ;;  %v1754_v6 = vadd.f32 %v1681_v40, %v1512_v54  ;;  %v1921_v28 = vsel %vm756_vm1, %v1919_v45, %v1920_v10  ;;  %v426_v61 = vmul.f32 %v3189_v33, %v3360_v1 }
  0xc1   : > { %v1923_v12 = vsel %vm756_vm1, %v1920_v10, %v1922_v62  ;;  %v358_v47 = vmul.f32 %v3178_v58, %v3363_v56  ;;  %v427_v19 = vmul.f32 %v3189_v33, %v3363_v56  ;;  %v428_v48 = vmul.f32 %v3189_v33, %v3365_v63 }
  0xc2   : > { %v1995_v13 = vadd.f32 %v1921_v28, %v1753_v2  ;;  %v1996_v14 = vadd.f32 %v1923_v12, %v1754_v6  ;;  %v529_v25 = vrot.slane %v426_v61, 1  ;;  %v669_v29 = vmul.f32 %v3200_v41, %v3360_v1 }
  0xc3   : > { %v530_v3 = vrot.slane %v427_v19, 1  ;;  %v532_v30 = vrot.slane %v428_v48, 1  ;;  %v670_v31 = vmul.f32 %v3200_v41, %v3363_v56  ;;  %v671_v35 = vmul.f32 %v3200_v41, %v3365_v63 }
  0xc4   : > { %v2031_v59 = vadd.f32 %v3308_v4, %v1995_v13  ;;  %v2032_v32 = vadd.f32 %v3308_v4, %v1996_v14  ;;  %v772_v22 = vrot.slane %v669_v29, 2  ;;  %v910_v60 = vmul.f32 %v3213_v55, %v3168_v20 }
  0xc5   : > { %v531_v34 = vsel %vm513_vm0, %v529_v25, %v530_v3  ;;  %v533_v43 = vsel %vm513_vm0, %v530_v3, %v532_v30  ;;  %v773_v0 = vrot.slane %v670_v31, 2  ;;  %v775_v11 = vrot.slane %v671_v35, 2 }
  0xc6   : > { %vm2063_vm4 = vcmp.gt.f32.partialorder %v2031_v59, 0.0  ;;  %vm2064_vm5 = vcmp.gt.f32.partialorder %v2032_v32, 0.0  ;;  %v2095_v44 = vmul.f32 0.01, %v2031_v59  ;;  %v2096_v27 = vmul.f32 0.01, %v2032_v32 }
  0xc7   : > { %v632_v45 = vadd.f32 %v531_v34, %v357_v26  ;;  %v633_v46 = vadd.f32 %v533_v43, %v358_v47  ;;  %v774_v54 = vsel %vm756_vm1, %v772_v22, %v773_v0  ;;  %v776_v40 = vsel %vm756_vm1, %v773_v0, %v775_v11 }
  0xc8   : > { %v2127_v10 = vsel %vm2063_vm4, %v2031_v59, %v2095_v44  ;;  %v2128_v62 = vsel %vm2064_vm5, %v2032_v32, %v2096_v27  ;;  %v911_v2 = vmul.f32 %v3213_v55, %v3171_v24  ;;  %v979_v6 = vmul.f32 %v3226_v49, %v3168_v20 }
  0xc9   : > { %v2147_v28 = vpack.c.bf16 %v2128_v62, %v2127_v10  ;;  %v875_v61 = vadd.f32 %v774_v54, %v632_v45  ;;  %v876_v12 = vadd.f32 %v776_v40, %v633_v46  ;;  %v980_v19 = vmul.f32 %v3226_v49, %v3171_v24  ;;  %v274_v40 = vld [vmem:[%s2669_s15 + $0x84] sm:$0xff]  }
  0xca   : > { %v981_v26 = vmul.f32 %v3226_v49, %v3173_v52  ;;  %v1081_v47 = vrot.slane %v979_v6, 1  ;;  %v1221_v48 = vmul.f32 %v3237_v53, %v3168_v20  ;;  %v1222_v13 = vmul.f32 %v3237_v53, %v3171_v24 }
  0xcb   : > { %v2199_v14 = vsel %vm2158_vm2, %v2147_v28, 0  ;;  %v942_v25 = vadd.f32 %v910_v60, %v875_v61  ;;  %v943_v29 = vadd.f32 %v911_v2, %v876_v12  ;;  %v1082_v3 = vrot.slane %v980_v19, 1 }
  0xcc   : > { %2226 = vmatpush.bf16.xpose.msra.mxu1 %v2199_v14  ;;  %v1084_v30 = vrot.slane %v981_v26, 1  ;;  %v1223_v31 = vmul.f32 %v3237_v53, %v3173_v52  ;;  %v1323_v35 = vrot.slane %v1221_v48, 2  ;;  %v1324_v59 = vrot.slane %v1222_v13, 2  ;;  %v276_v26 = vld [vmem:[%s2669_s15 + $0x8c] sm:$0x1] }
  0xcd   : > { %v1083_v32 = vsel %vm513_vm0, %v1081_v47, %v1082_v3  ;;  %v1461_v22 = vmul.f32 %v3250_v36, %v3025_v39  ;;  %v1462_v34 = vmul.f32 %v3250_v36, %v3029_v50  ;;  %v1530_v60 = vmul.f32 %v3261_v57, %v3025_v39 }
  0xce   : > { %v1085_v43 = vsel %vm513_vm0, %v1082_v3, %v1084_v30  ;;  %v1184_v0 = vadd.f32 %v1083_v32, %v942_v25  ;;  %v1325_v11 = vsel %vm756_vm1, %v1323_v35, %v1324_v59  ;;  %v1326_v44 = vrot.slane %v1223_v31, 2 }
  0xcf   : > { %v1185_v27 = vadd.f32 %v1085_v43, %v943_v29  ;;  %v1531_v45 = vmul.f32 %v3261_v57, %v3029_v50  ;;  %v1532_v46 = vmul.f32 %v3261_v57, %v3031_v51  ;;  %v1632_v54 = vrot.slane %v1530_v60, 1 }
  0xd0   : > { %v1327_v10 = vsel %vm756_vm1, %v1324_v59, %v1326_v44  ;;  %v1426_v62 = vadd.f32 %v1325_v11, %v1184_v0  ;;  %v1772_v2 = vmul.f32 %v3273_v5, %v3025_v39  ;;  %v1773_v6 = vmul.f32 %v3273_v5, %v3029_v50 }
  0xd1   : > { %v1427_v28 = vadd.f32 %v1327_v10, %v1185_v27  ;;  %v1633_v61 = vrot.slane %v1531_v45, 1  ;;  %v1635_v12 = vrot.slane %v1532_v46, 1  ;;  %v1774_v19 = vmul.f32 %v3273_v5, %v3031_v51 }
  0xd2   : > { %v1493_v47 = vadd.f32 %v1461_v22, %v1426_v62  ;;  %v1874_v48 = vrot.slane %v1772_v2, 2  ;;  %v1875_v13 = vrot.slane %v1773_v6, 2  ;;  %v3430_v14 = vunpack.c.l.bf16 %v274_v40 }
  0xd3   : > { %v1494_v25 = vadd.f32 %v1462_v34, %v1427_v28  ;;  %v1634_v29 = vsel %vm513_vm0, %v1632_v54, %v1633_v61  ;;  %v1636_v39 = vsel %vm513_vm0, %v1633_v61, %v1635_v12  ;;  %v1877_v3 = vrot.slane %v1774_v19, 2 }
  0xd4   : > { %v1735_v30 = vadd.f32 %v1634_v29, %v1493_v47  ;;  %v1876_v50 = vsel %vm756_vm1, %v1874_v48, %v1875_v13  ;;  %v3435_v31 = vunpack.c.h.bf16 %v274_v40  ;;  %v3437_v35 = vunpack.c.l.bf16 %v276_v26 }
  0xd5   : > { %v1736_v51 = vadd.f32 %v1636_v39, %v1494_v25  ;;  %v1878_v59 = vsel %vm756_vm1, %v1875_v13, %v1877_v3  ;;  %v373_v32 = vmul.f32 %v3178_v58, %v3430_v14  ;;  %v450_v22 = vmul.f32 %v3189_v33, %v3430_v14 }
  0xd6   : > { %v1977_v34 = vadd.f32 %v1876_v50, %v1735_v30  ;;  %v374_v60 = vmul.f32 %v3178_v58, %v3435_v31  ;;  %v451_v43 = vmul.f32 %v3189_v33, %v3435_v31  ;;  %v452_v0 = vmul.f32 %v3189_v33, %v3437_v35 }
  0xd7   : > { %v1978_v11 = vadd.f32 %v1878_v59, %v1736_v51  ;;  %v569_v44 = vrot.slane %v450_v22, 1  ;;  %v693_v27 = vmul.f32 %v3200_v41, %v3430_v14  ;;  %v694_v45 = vmul.f32 %v3200_v41, %v3435_v31 }
  0xd8   : > { %v2013_v46 = vadd.f32 %v3308_v4, %v1977_v34  ;;  %v570_v54 = vrot.slane %v451_v43, 1  ;;  %v572_v40 = vrot.slane %v452_v0, 1  ;;  %v695_v10 = vmul.f32 %v3200_v41, %v3437_v35 }
  0xd9   : > { %v2014_v62 = vadd.f32 %v3308_v4, %v1978_v11  ;;  %v812_v2 = vrot.slane %v693_v27, 2  ;;  %v813_v6 = vrot.slane %v694_v45, 2  ;;  %v926_v28 = vmul.f32 %v3213_v55, %v3284_v37 }
  0xda   : > { %vm2045_vm6 = vcmp.gt.f32.partialorder %v2013_v46, 0.0  ;;  %v2077_v61 = vmul.f32 0.01, %v2013_v46  ;;  %v571_v12 = vsel %vm513_vm0, %v569_v44, %v570_v54  ;;  %v573_v19 = vsel %vm513_vm0, %v570_v54, %v572_v40 }
  0xdb   : > { %vm2046_vm7 = vcmp.gt.f32.partialorder %v2014_v62, 0.0  ;;  %v2078_v26 = vmul.f32 0.01, %v2014_v62  ;;  %v648_v47 = vadd.f32 %v571_v12, %v373_v32  ;;  %v649_v48 = vadd.f32 %v573_v19, %v374_v60 }
  0xdc   : > { %v2109_v13 = vsel %vm2045_vm6, %v2013_v46, %v2077_v61  ;;  %v814_v25 = vsel %vm756_vm1, %v812_v2, %v813_v6  ;;  %v815_v29 = vrot.slane %v695_v10, 2  ;;  %v927_v39 = vmul.f32 %v3213_v55, %v3287_v38 }
  0xdd   : > { %v2110_v3 = vsel %vm2046_vm7, %v2014_v62, %v2078_v26  ;;  %v891_v30 = vadd.f32 %v814_v25, %v648_v47  ;;  %v1003_v50 = vmul.f32 %v3226_v49, %v3284_v37  ;;  %v1004_v51 = vmul.f32 %v3226_v49, %v3287_v38 }
  0xde   : > { %v2138_v59 = vpack.c.bf16 %v2110_v3, %v2109_v13  ;;  %v816_v22 = vsel %vm756_vm1, %v813_v6, %v815_v29  ;;  %v1005_v32 = vmul.f32 %v3226_v49, %v3290_v42  ;;  %v1245_v34 = vmul.f32 %v3237_v53, %v3284_v37 }
  0xdf   : > { %v892_v60 = vadd.f32 %v816_v22, %v649_v48  ;;  %v958_v43 = vadd.f32 %v926_v28, %v891_v30  ;;  %v1121_v0 = vrot.slane %v1003_v50, 1  ;;  %v1122_v11 = vrot.slane %v1004_v51, 1 }
  0xe0   : > { %v2172_v44 = vsel %vm2158_vm2, %v2138_v59, 0  ;;  %v1124_v27 = vrot.slane %v1005_v32, 1  ;;  %v1246_v45 = vmul.f32 %v3237_v53, %v3287_v38  ;;  %v1247_v46 = vmul.f32 %v3237_v53, %v3290_v42 }
  0xe1   : > { %2214 = vmatpush.bf16.xpose.msra.mxu0 %v2172_v44  ;;  %v959_v54 = vadd.f32 %v927_v39, %v892_v60  ;;  %v1123_v40 = vsel %vm513_vm0, %v1121_v0, %v1122_v11  ;;  %v1363_v10 = vrot.slane %v1245_v34, 2  ;;  %v1477_v62 = vmul.f32 %v3250_v36, %v3096_v9  ;;  %v2392_v39 = vld [vmem:[%s2669_s15 + $0x18] sm:$0xff]   ;;  %v249_v60 = vld [vmem:[%s2669_s15 + $0x20] sm:$0x1] }
  0xe2   : > { %v1125_v2 = vsel %vm513_vm0, %v1122_v11, %v1124_v27  ;;  %v1200_v6 = vadd.f32 %v1123_v40, %v958_v43  ;;  %v1364_v28 = vrot.slane %v1246_v45, 2  ;;  %v1366_v61 = vrot.slane %v1247_v46, 2 }
  0xe3   : > { %v1201_v12 = vadd.f32 %v1125_v2, %v959_v54  ;;  %v1478_v19 = vmul.f32 %v3250_v36, %v3101_v21  ;;  %v1554_v26 = vmul.f32 %v3261_v57, %v3096_v9  ;;  %v1555_v47 = vmul.f32 %v3261_v57, %v3101_v21 }
  0xe4   : > { %v1365_v48 = vsel %vm756_vm1, %v1363_v10, %v1364_v28  ;;  %v1367_v13 = vsel %vm756_vm1, %v1364_v28, %v1366_v61  ;;  %v1556_v25 = vmul.f32 %v3261_v57, %v3103_v23  ;;  %v1796_v29 = vmul.f32 %v3273_v5, %v3096_v9 }
  0xe5   : > { %v1442_v3 = vadd.f32 %v1365_v48, %v1200_v6  ;;  %v1443_v30 = vadd.f32 %v1367_v13, %v1201_v12  ;;  %v1672_v50 = vrot.slane %v1554_v26, 1  ;;  %v1673_v51 = vrot.slane %v1555_v47, 1 }
  0xe6   : > { %v1675_v59 = vrot.slane %v1556_v25, 1  ;;  %v1797_v22 = vmul.f32 %v3273_v5, %v3101_v21  ;;  %v1798_v32 = vmul.f32 %v3273_v5, %v3103_v23  ;;  %v1914_v34 = vrot.slane %v1796_v29, 2 }
  0xe7   : > { %v1509_v43 = vadd.f32 %v1477_v62, %v1442_v3  ;;  %v1510_v0 = vadd.f32 %v1478_v19, %v1443_v30  ;;  %v1674_v11 = vsel %vm513_vm0, %v1672_v50, %v1673_v51  ;;  %v3502_v44 = vunpack.c.l.bf16 %v2392_v39 }
  0xe8   : > { %v1676_v9 = vsel %vm513_vm0, %v1673_v51, %v1675_v59  ;;  %v1915_v27 = vrot.slane %v1797_v22, 2  ;;  %v1917_v45 = vrot.slane %v1798_v32, 2  ;;  %v3505_v46 = vunpack.c.h.bf16 %v2392_v39 }
  0xe9   : > { %v1751_v54 = vadd.f32 %v1674_v11, %v1509_v43  ;;  %v1752_v40 = vadd.f32 %v1676_v9, %v1510_v0  ;;  %v3507_v21 = vunpack.c.l.bf16 %v249_v60  ;;  %v355_v23 = vmul.f32 %v3178_v58, %v3502_v44 }
  0xea   : > { %v1916_v10 = vsel %vm756_vm1, %v1914_v34, %v1915_v27  ;;  %v1918_v62 = vsel %vm756_vm1, %v1915_v27, %v1917_v45  ;;  %v356_v2 = vmul.f32 %v3178_v58, %v3505_v46  ;;  %v423_v6 = vmul.f32 %v3189_v33, %v3502_v44 }
  0xeb   : > { %v1993_v28 = vadd.f32 %v1916_v10, %v1751_v54  ;;  %v1994_v61 = vadd.f32 %v1918_v62, %v1752_v40  ;;  %v424_v12 = vmul.f32 %v3189_v33, %v3505_v46  ;;  %v425_v19 = vmul.f32 %v3189_v33, %v3507_v21 }
  0xec   : > { %v524_v26 = vrot.slane %v423_v6, 1  ;;  %v666_v47 = vmul.f32 %v3200_v41, %v3502_v44  ;;  %v667_v48 = vmul.f32 %v3200_v41, %v3505_v46  ;;  %v668_v13 = vmul.f32 %v3200_v41, %v3507_v21 }
  0xed   : > { %v2029_v25 = vadd.f32 %v3308_v4, %v1993_v28  ;;  %v2030_v29 = vadd.f32 %v3308_v4, %v1994_v61  ;;  %v525_v39 = vrot.slane %v424_v12, 1  ;;  %v527_v3 = vrot.slane %v425_v19, 1 }
  0xee   : > { %v767_v30 = vrot.slane %v666_v47, 2  ;;  %v768_v50 = vrot.slane %v667_v48, 2  ;;  %v770_v51 = vrot.slane %v668_v13, 2  ;;  %v908_v59 = vmul.f32 %v3213_v55, %v3360_v1 }
  0xef   : > { %vm2061_vm8 = vcmp.gt.f32.partialorder %v2029_v25, 0.0  ;;  %vm2062_vm9 = vcmp.gt.f32.partialorder %v2030_v29, 0.0  ;;  %v2093_v22 = vmul.f32 0.01, %v2029_v25  ;;  %v2094_v32 = vmul.f32 0.01, %v2030_v29 }
  0xf0   : > { %v526_v34 = vsel %vm513_vm0, %v524_v26, %v525_v39  ;;  %v528_v60 = vsel %vm513_vm0, %v525_v39, %v527_v3  ;;  %v769_v43 = vsel %vm756_vm1, %v767_v30, %v768_v50  ;;  %v771_v0 = vsel %vm756_vm1, %v768_v50, %v770_v51 }
  0xf1   : > { %v2125_v11 = vsel %vm2061_vm8, %v2029_v25, %v2093_v22  ;;  %v2126_v9 = vsel %vm2062_vm9, %v2030_v29, %v2094_v32  ;;  %v630_v27 = vadd.f32 %v526_v34, %v355_v23  ;;  %v631_v45 = vadd.f32 %v528_v60, %v356_v2 }
  0xf2   : > { %v2146_v54 = vpack.c.bf16 %v2126_v9, %v2125_v11  ;;  %v909_v40 = vmul.f32 %v3213_v55, %v3363_v56  ;;  %v976_v10 = vmul.f32 %v3226_v49, %v3360_v1  ;;  %v977_v62 = vmul.f32 %v3226_v49, %v3363_v56 }
  0xf3   : > { %v873_v6 = vadd.f32 %v769_v43, %v630_v27  ;;  %v874_v28 = vadd.f32 %v771_v0, %v631_v45  ;;  %v978_v61 = vmul.f32 %v3226_v49, %v3365_v63  ;;  %v1218_v12 = vmul.f32 %v3237_v53, %v3360_v1  ;;  %v2396_v45 = vld [vmem:[%s2669_s15 + $0x78] sm:$0xff]  }
  0xf4   : > { %v2196_v23 = vsel %vm2158_vm2, %v2146_v54, 0  ;;  %v1076_v2 = vrot.slane %v976_v10, 1  ;;  %v1077_v19 = vrot.slane %v977_v62, 1  ;;  %v1219_v26 = vmul.f32 %v3237_v53, %v3363_v56 }
  0xf5   : > { %2227 = vmatpush.bf16.xpose.msra.mxu1 %v2196_v23  ;;  %v940_v47 = vadd.f32 %v908_v59, %v873_v6  ;;  %v941_v48 = vadd.f32 %v909_v40, %v874_v28  ;;  %v1079_v13 = vrot.slane %v978_v61, 1  ;;  %v1220_v25 = vmul.f32 %v3237_v53, %v3365_v63  ;;  %v273_v23 = vld [vmem:[%s2669_s15 + $0x80] sm:$0x1] }
  0xf6   : > { %v1078_v29 = vsel %vm513_vm0, %v1076_v2, %v1077_v19  ;;  %v1318_v39 = vrot.slane %v1218_v12, 2  ;;  %v1319_v3 = vrot.slane %v1219_v26, 2  ;;  %v1459_v30 = vmul.f32 %v3250_v36, %v3168_v20 }
  0xf7   : > { %v1080_v50 = vsel %vm513_vm0, %v1077_v19, %v1079_v13  ;;  %v1182_v51 = vadd.f32 %v1078_v29, %v940_v47  ;;  %v1321_v22 = vrot.slane %v1220_v25, 2  ;;  %v1460_v59 = vmul.f32 %v3250_v36, %v3171_v24 }
  0xf8   : > { %v1183_v32 = vadd.f32 %v1080_v50, %v941_v48  ;;  %v1320_v34 = vsel %vm756_vm1, %v1318_v39, %v1319_v3  ;;  %v1527_v60 = vmul.f32 %v3261_v57, %v3168_v20  ;;  %v1528_v43 = vmul.f32 %v3261_v57, %v3171_v24 }
  0xf9   : > { %v1322_v0 = vsel %vm756_vm1, %v1319_v3, %v1321_v22  ;;  %v1424_v11 = vadd.f32 %v1320_v34, %v1182_v51  ;;  %v1529_v9 = vmul.f32 %v3261_v57, %v3173_v52  ;;  %v1769_v27 = vmul.f32 %v3273_v5, %v3168_v20 }
  0xfa   : > { %v1425_v54 = vadd.f32 %v1322_v0, %v1183_v32  ;;  %v1627_v40 = vrot.slane %v1527_v60, 1  ;;  %v1628_v10 = vrot.slane %v1528_v43, 1  ;;  %v1770_v62 = vmul.f32 %v3273_v5, %v3171_v24 }
  0xfb   : > { %v1491_v6 = vadd.f32 %v1459_v30, %v1424_v11  ;;  %v1630_v28 = vrot.slane %v1529_v9, 1  ;;  %v1771_v61 = vmul.f32 %v3273_v5, %v3173_v52  ;;  %v1869_v12 = vrot.slane %v1769_v27, 2 }
  0xfc   : > { %v1492_v2 = vadd.f32 %v1460_v59, %v1425_v54  ;;  %v1629_v19 = vsel %vm513_vm0, %v1627_v40, %v1628_v10  ;;  %v1870_v26 = vrot.slane %v1770_v62, 2  ;;  %v3573_v47 = vunpack.c.l.bf16 %v2396_v45 }
  0xfd   : > { %v1631_v20 = vsel %vm513_vm0, %v1628_v10, %v1630_v28  ;;  %v1733_v48 = vadd.f32 %v1629_v19, %v1491_v6  ;;  %v1872_v13 = vrot.slane %v1771_v61, 2  ;;  %v3576_v25 = vunpack.c.h.bf16 %v2396_v45 }
  0xfe   : > { %v1734_v24 = vadd.f32 %v1631_v20, %v1492_v2  ;;  %v1871_v29 = vsel %vm756_vm1, %v1869_v12, %v1870_v26  ;;  %v3579_v39 = vunpack.c.l.bf16 %v273_v23  ;;  %v371_v52 = vmul.f32 %v3178_v58, %v3573_v47 }
  0xff   : > { %v1873_v3 = vsel %vm756_vm1, %v1870_v26, %v1872_v13  ;;  %v1975_v30 = vadd.f32 %v1871_v29, %v1733_v48  ;;  %v372_v50 = vmul.f32 %v3178_v58, %v3576_v25  ;;  %v447_v51 = vmul.f32 %v3189_v33, %v3573_v47 }
 0x100   : > { %v1976_v22 = vadd.f32 %v1873_v3, %v1734_v24  ;;  %v448_v59 = vmul.f32 %v3189_v33, %v3576_v25  ;;  %v449_v32 = vmul.f32 %v3189_v33, %v3579_v39  ;;  %v690_v34 = vmul.f32 %v3200_v41, %v3573_v47 }
 0x101   : > { %v2011_v60 = vadd.f32 %v3308_v4, %v1975_v30  ;;  %v564_v43 = vrot.slane %v447_v51, 1  ;;  %v691_v0 = vmul.f32 %v3200_v41, %v3576_v25  ;;  %v692_v58 = vmul.f32 %v3200_v41, %v3579_v39 }
 0x102   : > { %v2012_v11 = vadd.f32 %v3308_v4, %v1976_v22  ;;  %v565_v9 = vrot.slane %v448_v59, 1  ;;  %v567_v27 = vrot.slane %v449_v32, 1  ;;  %v807_v45 = vrot.slane %v690_v34, 2 }
 0x103   : > { %vm2043_vm10 = vcmp.gt.f32.partialorder %v2011_v60, 0.0  ;;  %v2075_v54 = vmul.f32 0.01, %v2011_v60  ;;  %v808_v33 = vrot.slane %v691_v0, 2  ;;  %v810_v40 = vrot.slane %v692_v58, 2 }
 0x104   : > { %vm2044_vm11 = vcmp.gt.f32.partialorder %v2012_v11, 0.0  ;;  %v2076_v10 = vmul.f32 0.01, %v2012_v11  ;;  %v566_v62 = vsel %vm513_vm0, %v564_v43, %v565_v9  ;;  %v568_v6 = vsel %vm513_vm0, %v565_v9, %v567_v27 }
 0x105   : > { %v2107_v28 = vsel %vm2043_vm10, %v2011_v60, %v2075_v54  ;;  %v646_v61 = vadd.f32 %v566_v62, %v371_v52  ;;  %v647_v12 = vadd.f32 %v568_v6, %v372_v50  ;;  %v809_v41 = vsel %vm756_vm1, %v807_v45, %v808_v33 }
 0x106   : > { %v2108_v23 = vsel %vm2044_vm11, %v2012_v11, %v2076_v10  ;;  %v811_v2 = vsel %vm756_vm1, %v808_v33, %v810_v40  ;;  %v924_v19 = vmul.f32 %v3213_v55, %v3430_v14  ;;  %v925_v26 = vmul.f32 %v3213_v55, %v3435_v31 }
 0x107   : > { %v2137_v20 = vpack.c.bf16 %v2108_v23, %v2107_v28  ;;  %v889_v48 = vadd.f32 %v809_v41, %v646_v61  ;;  %v890_v13 = vadd.f32 %v811_v2, %v647_v12  ;;  %v1000_v24 = vmul.f32 %v3226_v49, %v3430_v14  ;;  %v246_v2 = vld [vmem:[%s2669_s15 + $0x14] sm:$0x1] }
 0x108   : > { %v1001_v29 = vmul.f32 %v3226_v49, %v3435_v31  ;;  %v1002_v52 = vmul.f32 %v3226_v49, %v3437_v35  ;;  %v1242_v3 = vmul.f32 %v3237_v53, %v3430_v14  ;;  %v1243_v30 = vmul.f32 %v3237_v53, %v3435_v31 }
 0x109   : > { %v2169_v55 = vsel %vm2158_vm2, %v2137_v20, 0  ;;  %v956_v50 = vadd.f32 %v924_v19, %v889_v48  ;;  %v957_v51 = vadd.f32 %v925_v26, %v890_v13  ;;  %v1116_v22 = vrot.slane %v1000_v24, 1 }
 0x10a   : > { %2215 = vmatpush.bf16.xpose.msra.mxu0 %v2169_v55  ;;  %v1117_v59 = vrot.slane %v1001_v29, 1  ;;  %v1119_v32 = vrot.slane %v1002_v52, 1  ;;  %v1244_v34 = vmul.f32 %v3237_v53, %v3437_v35  ;;  %v1358_v60 = vrot.slane %v1242_v3, 2 }
 0x10b   : > { %v1359_v49 = vrot.slane %v1243_v30, 2  ;;  %v1475_v43 = vmul.f32 %v3250_v36, %v3284_v37  ;;  %v1476_v0 = vmul.f32 %v3250_v36, %v3287_v38  ;;  %v1551_v58 = vmul.f32 %v3261_v57, %v3284_v37  ;;  %v244_v36 = vld [vmem:[%s2669_s15 + $0xc] sm:$0xff]  }
 0x10c   : > { %v1118_v11 = vsel %vm513_vm0, %v1116_v22, %v1117_v59  ;;  %v1120_v9 = vsel %vm513_vm0, %v1117_v59, %v1119_v32  ;;  %v1361_v27 = vrot.slane %v1244_v34, 2  ;;  %v1552_v53 = vmul.f32 %v3261_v57, %v3287_v38 }
 0x10d   : > { %v1198_v45 = vadd.f32 %v1118_v11, %v956_v50  ;;  %v1199_v54 = vadd.f32 %v1120_v9, %v957_v51  ;;  %v1360_v33 = vsel %vm756_vm1, %v1358_v60, %v1359_v49  ;;  %v1553_v40 = vmul.f32 %v3261_v57, %v3290_v42  ;;  %v3662_v51 = vld [vmem:[%s3998_s1 + $0x1] ss:$0 sm:$0xff] }
 0x10e   : > { %v1362_v10 = vsel %vm756_vm1, %v1359_v49, %v1361_v27  ;;  %v1667_v62 = vrot.slane %v1551_v58, 1  ;;  %v1668_v6 = vrot.slane %v1552_v53, 1  ;;  %v1793_v28 = vmul.f32 %v3273_v5, %v3284_v37  ;;  %v3676_v58 = vld [vmem:[%s3998_s1 + $0x2] ss:$0 sm:$0xff] }
 0x10f   : > { %v1440_v61 = vadd.f32 %v1360_v33, %v1198_v45  ;;  %v1441_v12 = vadd.f32 %v1362_v10, %v1199_v54  ;;  %v1670_v41 = vrot.slane %v1553_v40, 1  ;;  %v1794_v23 = vmul.f32 %v3273_v5, %v3287_v38  ;;  %v3654_v38 = vld [vmem:[%s3998_s1] ss:$0 sm:$0xff] }
 0x110   : > { %v1669_v19 = vsel %vm513_vm0, %v1667_v62, %v1668_v6  ;;  %v1795_v26 = vmul.f32 %v3273_v5, %v3290_v42  ;;  %v1909_v20 = vrot.slane %v1793_v28, 2  ;;  %v3644_v48 = vunpack.c.l.bf16 %v244_v36 }
 0x111   : > { %v1507_v13 = vadd.f32 %v1475_v43, %v1440_v61  ;;  %v1508_v24 = vadd.f32 %v1476_v0, %v1441_v12  ;;  %v1671_v29 = vsel %vm513_vm0, %v1668_v6, %v1670_v41  ;;  %v1910_v37 = vrot.slane %v1794_v23, 2 }
 0x112   : > { %v1912_v52 = vrot.slane %v1795_v26, 2  ;;  %v3647_v3 = vunpack.c.h.bf16 %v244_v36  ;;  %v3649_v30 = vunpack.c.l.bf16 %v246_v2  ;;  %v353_v5 = vmul.f32 %v3654_v38, %v3644_v48  ;;  %v3689_v36 = vld [vmem:[%s3998_s1 + $0x4] ss:$0 sm:$0xff] }
 0x113   : > { %v1749_v42 = vadd.f32 %v1669_v19, %v1507_v13  ;;  %v1750_v55 = vadd.f32 %v1671_v29, %v1508_v24  ;;  %v1911_v50 = vsel %vm756_vm1, %v1909_v20, %v1910_v37  ;;  %v420_v22 = vmul.f32 %v3662_v51, %v3644_v48  ;;  %v3702_v24 = vld [vmem:[%s3998_s1 + $0x5] ss:$0 sm:$0xff] }
 0x114   : > { %v1913_v59 = vsel %vm756_vm1, %v1910_v37, %v1912_v52  ;;  %v354_v32 = vmul.f32 %v3654_v38, %v3647_v3  ;;  %v421_v34 = vmul.f32 %v3662_v51, %v3647_v3  ;;  %v422_v60 = vmul.f32 %v3662_v51, %v3649_v30 }
 0x115   : > { %v1991_v49 = vadd.f32 %v1911_v50, %v1749_v42  ;;  %v1992_v43 = vadd.f32 %v1913_v59, %v1750_v55  ;;  %v519_v0 = vrot.slane %v420_v22, 1  ;;  %v663_v11 = vmul.f32 %v3676_v58, %v3644_v48  ;;  %v3713_v22 = vld [vmem:[%s3998_s1 + $0x6] ss:$0 sm:$0xff] }
 0x116   : > { %v520_v9 = vrot.slane %v421_v34, 1  ;;  %v522_v27 = vrot.slane %v422_v60, 1  ;;  %v664_v53 = vmul.f32 %v3676_v58, %v3647_v3  ;;  %v665_v45 = vmul.f32 %v3676_v58, %v3649_v30 }
 0x117   : > { %v2027_v54 = vadd.f32 %v3308_v4, %v1991_v49  ;;  %v2028_v33 = vadd.f32 %v3308_v4, %v1992_v43  ;;  %v762_v40 = vrot.slane %v663_v11, 2  ;;  %v906_v10 = vmul.f32 %v3689_v36, %v3502_v44 }
 0x118   : > { %v521_v62 = vsel %vm513_vm0, %v519_v0, %v520_v9  ;;  %v523_v6 = vsel %vm513_vm0, %v520_v9, %v522_v27  ;;  %v763_v28 = vrot.slane %v664_v53, 2  ;;  %v765_v61 = vrot.slane %v665_v45, 2  ;;  %v3726_v45 = vld [vmem:[%s3998_s1 + $0x8] ss:$0 sm:$0xff] }
 0x119   : > { %vm2059_vm12 = vcmp.gt.f32.partialorder %v2027_v54, 0.0  ;;  %vm2060_vm13 = vcmp.gt.f32.partialorder %v2028_v33, 0.0  ;;  %v2091_v12 = vmul.f32 0.01, %v2027_v54  ;;  %v2092_v41 = vmul.f32 0.01, %v2028_v33 }
 0x11a   : > { %v628_v4 = vadd.f32 %v521_v62, %v353_v5  ;;  %v629_v23 = vadd.f32 %v523_v6, %v354_v32  ;;  %v764_v2 = vsel %vm756_vm1, %v762_v40, %v763_v28  ;;  %v766_v19 = vsel %vm756_vm1, %v763_v28, %v765_v61 }
 0x11b   : > { %v2123_v26 = vsel %vm2059_vm12, %v2027_v54, %v2091_v12  ;;  %v2124_v20 = vsel %vm2060_vm13, %v2028_v33, %v2092_v41  ;;  %v907_v13 = vmul.f32 %v3689_v36, %v3505_v46  ;;  %v973_v29 = vmul.f32 %v3702_v24, %v3502_v44  ;;  %v3739_v12 = vld [vmem:[%s3998_s1 + $0x9] ss:$0 sm:$0xff] }
 0x11c   : > { %v2145_v37 = vpack.c.bf16 %v2124_v20, %v2123_v26  ;;  %v871_v52 = vadd.f32 %v764_v2, %v628_v4  ;;  %v872_v5 = vadd.f32 %v766_v19, %v629_v23  ;;  %v974_v42 = vmul.f32 %v3702_v24, %v3505_v46  ;;  %v3749_v19 = vld [vmem:[%s3998_s1 + $0xa] ss:$0 sm:$0xff] }
 0x11d   : > { %v975_v55 = vmul.f32 %v3702_v24, %v3507_v21  ;;  %v1071_v50 = vrot.slane %v973_v29, 1  ;;  %v1215_v59 = vmul.f32 %v3713_v22, %v3502_v44  ;;  %v1216_v32 = vmul.f32 %v3713_v22, %v3505_v46 }
 0x11e   : > { %v2193_v34 = vsel %vm2158_vm2, %v2145_v37, 0  ;;  %v938_v60 = vadd.f32 %v906_v10, %v871_v52  ;;  %v939_v49 = vadd.f32 %v907_v13, %v872_v5  ;;  %v1072_v43 = vrot.slane %v974_v42, 1 }
 0x11f   : > { %2228 = vmatpush.bf16.xpose.msra.mxu1 %v2193_v34  ;;  %v1074_v0 = vrot.slane %v975_v55, 1  ;;  %v1217_v11 = vmul.f32 %v3713_v22, %v3507_v21  ;;  %v1313_v9 = vrot.slane %v1215_v59, 2  ;;  %v1314_v27 = vrot.slane %v1216_v32, 2 }
 0x120   : > { %v1073_v53 = vsel %vm513_vm0, %v1071_v50, %v1072_v43  ;;  %v1457_v54 = vmul.f32 %v3726_v45, %v3360_v1  ;;  %v1458_v33 = vmul.f32 %v3726_v45, %v3363_v56  ;;  %v1524_v40 = vmul.f32 %v3261_v57, %v3360_v1 }
 0x121   : > { %v1075_v10 = vsel %vm513_vm0, %v1072_v43, %v1074_v0  ;;  %v1180_v62 = vadd.f32 %v1073_v53, %v938_v60  ;;  %v1315_v6 = vsel %vm756_vm1, %v1313_v9, %v1314_v27  ;;  %v1316_v28 = vrot.slane %v1217_v11, 2 }
 0x122   : > { %v1181_v61 = vadd.f32 %v1075_v10, %v939_v49  ;;  %v1525_v41 = vmul.f32 %v3739_v12, %v3363_v56  ;;  %v1526_v4 = vmul.f32 %v3739_v12, %v3365_v63  ;;  %v1622_v23 = vrot.slane %v1524_v40, 1 }
 0x123   : > { %v1317_v57 = vsel %vm756_vm1, %v1314_v27, %v1316_v28  ;;  %v1422_v2 = vadd.f32 %v1315_v6, %v1180_v62  ;;  %v1766_v26 = vmul.f32 %v3749_v19, %v3360_v1  ;;  %v1767_v20 = vmul.f32 %v3749_v19, %v3363_v56  ;;  %v3780_v28 = vld [vmem:[%s3999_s2] ss:$0 sm:$0xff] }
 0x124   : > { %v1423_v13 = vadd.f32 %v1317_v57, %v1181_v61  ;;  %v1623_v29 = vrot.slane %v1525_v41, 1  ;;  %v1625_v37 = vrot.slane %v1526_v4, 1  ;;  %v1768_v52 = vmul.f32 %v3749_v19, %v3365_v63 }
 0x125   : > { %v1489_v5 = vadd.f32 %v1457_v54, %v1422_v2  ;;  %v1864_v42 = vrot.slane %v1766_v26, 2  ;;  %v1865_v55 = vrot.slane %v1767_v20, 2  ;;  %v369_v50 = vmul.f32 %v3654_v38, %v2699_v16 }
 0x126   : > { %v1490_v59 = vadd.f32 %v1458_v33, %v1423_v13  ;;  %v1624_v32 = vsel %vm513_vm0, %v1622_v23, %v1623_v29  ;;  %v1626_v1 = vsel %vm513_vm0, %v1623_v29, %v1625_v37  ;;  %v1867_v34 = vrot.slane %v1768_v52, 2 }
 0x127   : > { %v1731_v60 = vadd.f32 %v1624_v32, %v1489_v5  ;;  %v1866_v56 = vsel %vm756_vm1, %v1864_v42, %v1865_v55  ;;  %v370_v49 = vmul.f32 %v3654_v38, %v2701_v17  ;;  %v444_v63 = vmul.f32 %v3662_v51, %v2699_v16 }
 0x128   : > { %v1732_v43 = vadd.f32 %v1626_v1, %v1490_v59  ;;  %v1868_v0 = vsel %vm756_vm1, %v1865_v55, %v1867_v34  ;;  %v445_v11 = vmul.f32 %v3662_v51, %v2701_v17  ;;  %v446_v9 = vmul.f32 %v3662_v51, %v2703_v18 }
 0x129   : > { %v1973_v27 = vadd.f32 %v1866_v56, %v1731_v60  ;;  %v559_v53 = vrot.slane %v444_v63, 1  ;;  %v687_v54 = vmul.f32 %v3676_v58, %v2699_v16  ;;  %v688_v33 = vmul.f32 %v3676_v58, %v2701_v17 }
 0x12a   : > { %v1974_v40 = vadd.f32 %v1868_v0, %v1732_v43  ;;  %v560_v10 = vrot.slane %v445_v11, 1  ;;  %v562_v62 = vrot.slane %v446_v9, 1  ;;  %v689_v6 = vmul.f32 %v3676_v58, %v2703_v18 }
 0x12b   : > { %v2009_v61 = vadd.f32 %v3780_v28, %v1973_v27  ;;  %v802_v41 = vrot.slane %v687_v54, 2  ;;  %v803_v4 = vrot.slane %v688_v33, 2  ;;  %v922_v23 = vmul.f32 %v3689_v36, %v3573_v47 }
 0x12c   : > { %v2010_v57 = vadd.f32 %v3780_v28, %v1974_v40  ;;  %v561_v2 = vsel %vm513_vm0, %v559_v53, %v560_v10  ;;  %v563_v26 = vsel %vm513_vm0, %v560_v10, %v562_v62  ;;  %v805_v20 = vrot.slane %v689_v6, 2 }
 0x12d   : > { %vm2041_vm14 = vcmp.gt.f32.partialorder %v2009_v61, 0.0  ;;  %v2073_v13 = vmul.f32 0.01, %v2009_v61  ;;  %v644_v29 = vadd.f32 %v561_v2, %v369_v50  ;;  %v645_v37 = vadd.f32 %v563_v26, %v370_v49 }
 0x12e   : > { %vm2042_vm15 = vcmp.gt.f32.partialorder %v2010_v57, 0.0  ;;  %v2074_v52 = vmul.f32 0.01, %v2010_v57  ;;  %v804_v5 = vsel %vm756_vm1, %v802_v41, %v803_v4  ;;  %v806_v42 = vsel %vm756_vm1, %v803_v4, %v805_v20 }
 0x12f   : > { %v2105_v55 = vsel %vm2041_vm14, %v2009_v61, %v2073_v13  ;;  %v887_v59 = vadd.f32 %v804_v5, %v644_v29  ;;  %v888_v32 = vadd.f32 %v806_v42, %v645_v37  ;;  %v923_v1 = vmul.f32 %v3689_v36, %v3576_v25  ;;  %v2357_v37 = vld [vmem:[%s2669_s15] sm:$0xff]  }
 0x130   : > { %v2106_v34 = vsel %vm2042_vm15, %v2010_v57, %v2074_v52  ;;  %v997_v60 = vmul.f32 %v3702_v24, %v3573_v47  ;;  %v998_v50 = vmul.f32 %v3702_v24, %v3576_v25  ;;  %v999_v56 = vmul.f32 %v3702_v24, %v3579_v39 }
 0x131   : > { %v2136_v49 = vpack.c.bf16 %v2106_v34, %v2105_v55  ;;  %v954_v63 = vadd.f32 %v922_v23, %v887_v59  ;;  %v955_v43 = vadd.f32 %v923_v1, %v888_v32  ;;  %v1239_v0 = vmul.f32 %v3713_v22, %v3573_v47 }
 0x132   : > { %v1111_v11 = vrot.slane %v997_v60, 1  ;;  %v1112_v9 = vrot.slane %v998_v50, 1  ;;  %v1114_v27 = vrot.slane %v999_v56, 1  ;;  %v1240_v53 = vmul.f32 %v3713_v22, %v3576_v25  ;;  %v243_v60 = vld [vmem:[%s2669_s15 + $0x8] sm:$0x1]  ;;  %s2504_s15 = scalar_lea.hbm %s2503_s14, 16 }
 0x133   : > { %v2166_v54 = vsel %vm2158_vm2, %v2136_v49, 0  ;;  %v1241_v33 = vmul.f32 %v3713_v22, %v3579_v39  ;;  %v1353_v40 = vrot.slane %v1239_v0, 2  ;;  %v1473_v10 = vmul.f32 %v3726_v45, %v3430_v14  ;;  %p2505_p12 = scmp.ne.s32.totalorder %s2503_s14, %s2504_s15  ;;  %p2510_p2 = scmp.lt.s32.totalorder %s2508_s17, %s2504_s15 }
 0x134   : > { %2216 = vmatpush.bf16.xpose.msra.mxu0 %v2166_v54  ;;  %v1113_v62 = vsel %vm513_vm0, %v1111_v11, %v1112_v9  ;;  %v1115_v6 = vsel %vm513_vm0, %v1112_v9, %v1114_v27  ;;  %v1354_v61 = vrot.slane %v1240_v53, 2  ;;  %v1474_v41 = vmul.f32 %v3726_v45, %v3435_v31 }
 0x135   : > { %v1196_v4 = vadd.f32 %v1113_v62, %v954_v63  ;;  %v1197_v23 = vadd.f32 %v1115_v6, %v955_v43  ;;  %v1356_v57 = vrot.slane %v1241_v33, 2  ;;  %v1548_v2 = vmul.f32 %v3739_v12, %v3430_v14  ;;  %p2506_p13 = pnand %p2505_p12, %p2639_p4  ;;  %p2511_p3 = por %p2510_p2, %p2509_p1 }
 0x136   : > { %v1355_v26 = vsel %vm756_vm1, %v1353_v40, %v1354_v61  ;;  %v1549_v20 = vmul.f32 %v3739_v12, %v3435_v31  ;;  %v1550_v13 = vmul.f32 %v3739_v12, %v3437_v35  ;;  %v1790_v29 = vmul.f32 %v3749_v19, %v3430_v14 }
 0x137   : > { %v1357_v52 = vsel %vm756_vm1, %v1354_v61, %v1356_v57  ;;  %v1438_v5 = vadd.f32 %v1355_v26, %v1196_v4  ;;  %v1662_v42 = vrot.slane %v1548_v2, 1  ;;  %v1791_v55 = vmul.f32 %v3749_v19, %v3435_v31  ;;  %p2507_p0 = pneg %p2506_p13 }
 0x138   : > { %v1439_v59 = vadd.f32 %v1357_v52, %v1197_v23  ;;  %v1663_v32 = vrot.slane %v1549_v20, 1  ;;  %v1665_v1 = vrot.slane %v1550_v13, 1  ;;  %v1792_v34 = vmul.f32 %v3749_v19, %v3437_v35 }
 0x139   : > { %v1505_v50 = vadd.f32 %v1473_v10, %v1438_v5  ;;  %v1904_v56 = vrot.slane %v1790_v29, 2  ;;  %v1905_v49 = vrot.slane %v1791_v55, 2  ;;  %v2358_v63 = vunpack.c.l.bf16 %v2357_v37  ;;  %p2512_p5 = pnand %p2511_p3, %p2507_p0 }
 0x13a   : > { %v1506_v14 = vadd.f32 %v1474_v41, %v1439_v59  ;;  %v1664_v43 = vsel %vm513_vm0, %v1662_v42, %v1663_v32  ;;  %v1666_v0 = vsel %vm513_vm0, %v1663_v32, %v1665_v1  ;;  %v1907_v11 = vrot.slane %v1792_v34, 2 }
 0x13b   : > { %v1747_v9 = vadd.f32 %v1664_v43, %v1505_v50  ;;  %v1906_v31 = vsel %vm756_vm1, %v1904_v56, %v1905_v49  ;;  %v2359_v27 = vunpack.c.h.bf16 %v2357_v37  ;;  %v297_v53 = vunpack.c.l.bf16 %v243_v60 }
 0x13c   : > { %v1748_v54 = vadd.f32 %v1666_v0, %v1506_v14  ;;  %v1908_v33 = vsel %vm756_vm1, %v1905_v49, %v1907_v11  ;;  %v351_v35 = vmul.f32 %v3654_v38, %v2358_v63  ;;  %v417_v40 = vmul.f32 %v3662_v51, %v2358_v63 }
 0x13d   : > { %v1989_v10 = vadd.f32 %v1906_v31, %v1747_v9  ;;  %v352_v62 = vmul.f32 %v3654_v38, %v2359_v27  ;;  %v418_v6 = vmul.f32 %v3662_v51, %v2359_v27  ;;  %v419_v61 = vmul.f32 %v3662_v51, %v297_v53 }
 0x13e   : > { %v1990_v41 = vadd.f32 %v1908_v33, %v1748_v54  ;;  %v514_v4 = vrot.slane %v417_v40, 1  ;;  %v660_v23 = vmul.f32 %v3676_v58, %v2358_v63  ;;  %v661_v57 = vmul.f32 %v3676_v58, %v2359_v27 }
 0x13f   : > { %v2025_v2 = vadd.f32 %v3780_v28, %v1989_v10  ;;  %v515_v26 = vrot.slane %v418_v6, 1  ;;  %v517_v20 = vrot.slane %v419_v61, 1  ;;  %v662_v13 = vmul.f32 %v3676_v58, %v297_v53 }
 0x140   : > { %v2026_v29 = vadd.f32 %v3780_v28, %v1990_v41  ;;  %v757_v37 = vrot.slane %v660_v23, 2  ;;  %v758_v52 = vrot.slane %v661_v57, 2  ;;  %v904_v5 = vmul.f32 %v3689_v36, %v3644_v48 }
 0x141   : > { %vm2057_vm3 = vcmp.gt.f32.partialorder %v2025_v2, 0.0  ;;  %v2089_v42 = vmul.f32 0.01, %v2025_v2  ;;  %v516_v55 = vsel %vm513_vm0, %v514_v4, %v515_v26  ;;  %v518_v59 = vsel %vm513_vm0, %v515_v26, %v517_v20 }
 0x142   : > { %vm2058_vm4 = vcmp.gt.f32.partialorder %v2026_v29, 0.0  ;;  %v2090_v32 = vmul.f32 0.01, %v2026_v29  ;;  %v626_v1 = vadd.f32 %v516_v55, %v351_v35  ;;  %v627_v34 = vadd.f32 %v518_v59, %v352_v62 }
 0x143   : > { %v2121_v60 = vsel %vm2057_vm3, %v2025_v2, %v2089_v42  ;;  %v759_v50 = vsel %vm756_vm1, %v757_v37, %v758_v52  ;;  %v760_v56 = vrot.slane %v662_v13, 2  ;;  %v905_v49 = vmul.f32 %v3689_v36, %v3647_v3 }
 0x144   : > { %v2122_v63 = vsel %vm2058_vm4, %v2026_v29, %v2090_v32  ;;  %v869_v14 = vadd.f32 %v759_v50, %v626_v1  ;;  %v970_v43 = vmul.f32 %v3702_v24, %v3644_v48  ;;  %v971_v0 = vmul.f32 %v3702_v24, %v3647_v3 }
 0x145   : > { %v2144_v11 = vpack.c.bf16 %v2122_v63, %v2121_v60  ;;  %v761_v9 = vsel %vm756_vm1, %v758_v52, %v760_v56  ;;  %v972_v31 = vmul.f32 %v3702_v24, %v3649_v30  ;;  %v1212_v27 = vmul.f32 %v3713_v22, %v3644_v48 }
 0x146   : > { %v870_v53 = vadd.f32 %v761_v9, %v627_v34  ;;  %v936_v54 = vadd.f32 %v904_v5, %v869_v14  ;;  %v1066_v33 = vrot.slane %v970_v43, 1  ;;  %v1067_v35 = vrot.slane %v971_v0, 1 }
 0x147   : > { %v2190_v40 = vsel %vm2158_vm2, %v2144_v11, 0  ;;  %v1069_v10 = vrot.slane %v972_v31, 1  ;;  %v1213_v62 = vmul.f32 %v3713_v22, %v3647_v3  ;;  %v1214_v6 = vmul.f32 %v3713_v22, %v3649_v30 }
 0x148   : > { %2229 = vmatpush.bf16.xpose.msra.mxu1 %v2190_v40  ;;  %v937_v61 = vadd.f32 %v905_v49, %v870_v53  ;;  %v1068_v41 = vsel %vm513_vm0, %v1066_v33, %v1067_v35  ;;  %v1308_v4 = vrot.slane %v1212_v27, 2  ;;  %v1455_v48 = vmul.f32 %v3726_v45, %v3502_v44 }
 0x149   : > { %v1070_v23 = vsel %vm513_vm0, %v1067_v35, %v1069_v10  ;;  %v1178_v57 = vadd.f32 %v1068_v41, %v936_v54  ;;  %v1309_v2 = vrot.slane %v1213_v62, 2  ;;  %v1311_v26 = vrot.slane %v1214_v6, 2 }
 0x14a   : > { %v1179_v20 = vadd.f32 %v1070_v23, %v937_v61  ;;  %v1456_v3 = vmul.f32 %v3726_v45, %v3505_v46  ;;  %v1521_v30 = vmul.f32 %v3739_v12, %v3502_v44  ;;  %v1522_v13 = vmul.f32 %v3739_v12, %v3505_v46 }
 0x14b   : > { %v1310_v29 = vsel %vm756_vm1, %v1308_v4, %v1309_v2  ;;  %v1312_v37 = vsel %vm756_vm1, %v1309_v2, %v1311_v26  ;;  %v1523_v52 = vmul.f32 %v3739_v12, %v3507_v21  ;;  %v1763_v5 = vmul.f32 %v3749_v19, %v3502_v44 }
 0x14c   : > { %v1420_v42 = vadd.f32 %v1310_v29, %v1178_v57  ;;  %v1421_v55 = vadd.f32 %v1312_v37, %v1179_v20  ;;  %v1617_v59 = vrot.slane %v1521_v30, 1  ;;  %v1618_v32 = vrot.slane %v1522_v13, 1 }
 0x14d   : > { %v1620_v1 = vrot.slane %v1523_v52, 1  ;;  %v1764_v34 = vmul.f32 %v3749_v19, %v3505_v46  ;;  %v1765_v60 = vmul.f32 %v3749_v19, %v3507_v21  ;;  %v1859_v50 = vrot.slane %v1763_v5, 2 }
 0x14e   : > { %v1487_v56 = vadd.f32 %v1455_v48, %v1420_v42  ;;  %v1488_v49 = vadd.f32 %v1456_v3, %v1421_v55  ;;  %v1619_v63 = vsel %vm513_vm0, %v1617_v59, %v1618_v32  ;;  %v367_v14 = vmul.f32 %v3654_v38, %v2684_v7 }
 0x14f   : > { %v1621_v44 = vsel %vm513_vm0, %v1618_v32, %v1620_v1  ;;  %v1860_v43 = vrot.slane %v1764_v34, 2  ;;  %v1862_v0 = vrot.slane %v1765_v60, 2  ;;  %v368_v11 = vmul.f32 %v3654_v38, %v2686_v8 }
 0x150   : > { %v1729_v9 = vadd.f32 %v1619_v63, %v1487_v56  ;;  %v1730_v46 = vadd.f32 %v1621_v44, %v1488_v49  ;;  %v441_v21 = vmul.f32 %v3662_v51, %v2684_v7  ;;  %v442_v31 = vmul.f32 %v3662_v51, %v2686_v8 }
 0x151   : > { %v1861_v27 = vsel %vm756_vm1, %v1859_v50, %v1860_v43  ;;  %v1863_v53 = vsel %vm756_vm1, %v1860_v43, %v1862_v0  ;;  %v443_v54 = vmul.f32 %v3662_v51, %v2697_v15  ;;  %v684_v33 = vmul.f32 %v3676_v58, %v2684_v7 }
 0x152   : > { %v1971_v35 = vadd.f32 %v1861_v27, %v1729_v9  ;;  %v1972_v38 = vadd.f32 %v1863_v53, %v1730_v46  ;;  %v554_v40 = vrot.slane %v441_v21, 1  ;;  %v555_v10 = vrot.slane %v442_v31, 1 }
 0x153   : > { %v557_v62 = vrot.slane %v443_v54, 1  ;;  %v685_v6 = vmul.f32 %v3676_v58, %v2686_v8  ;;  %v686_v61 = vmul.f32 %v3676_v58, %v2697_v15  ;;  %v797_v41 = vrot.slane %v684_v33, 2 }
 0x154   : > { %v2007_v4 = vadd.f32 %v3780_v28, %v1971_v35  ;;  %v2008_v48 = vadd.f32 %v3780_v28, %v1972_v38  ;;  %v556_v51 = vsel %vm513_vm0, %v554_v40, %v555_v10  ;;  %v920_v7 = vmul.f32 %v3689_v36, %v2699_v16  ;;  %v2151_v35 = vld [vmem:[%s4000_s3] sm:$0xf] }
 0x155   : > { %v558_v23 = vsel %vm513_vm0, %v555_v10, %v557_v62  ;;  %v642_v57 = vadd.f32 %v556_v51, %v367_v14  ;;  %v798_v2 = vrot.slane %v685_v6, 2  ;;  %v800_v26 = vrot.slane %v686_v61, 2 }
 0x156   : > { %vm2039_vm5 = vcmp.gt.f32.partialorder %v2007_v4, 0.0  ;;  %vm2040_vm6 = vcmp.gt.f32.partialorder %v2008_v48, 0.0  ;;  %v2071_v8 = vmul.f32 0.01, %v2007_v4  ;;  %v2072_v20 = vmul.f32 0.01, %v2008_v48 }
 0x157   : > { %v643_v15 = vadd.f32 %v558_v23, %v368_v11  ;;  %v799_v58 = vsel %vm756_vm1, %v797_v41, %v798_v2  ;;  %v801_v3 = vsel %vm756_vm1, %v798_v2, %v800_v26  ;;  %v921_v30 = vmul.f32 %v3689_v36, %v2701_v17 }
 0x158   : > { %v2103_v13 = vsel %vm2039_vm5, %v2007_v4, %v2071_v8  ;;  %v2104_v29 = vsel %vm2040_vm6, %v2008_v48, %v2072_v20  ;;  %v885_v37 = vadd.f32 %v799_v58, %v642_v57  ;;  %v994_v52 = vmul.f32 %v3702_v24, %v2699_v16 }
 0x159   : > { %v2135_v5 = vpack.c.bf16 %v2104_v29, %v2103_v13  ;;  %v886_v42 = vadd.f32 %v801_v3, %v643_v15  ;;  %v995_v55 = vmul.f32 %v3702_v24, %v2701_v17  ;;  %v996_v59 = vmul.f32 %v3702_v24, %v2703_v18 }
 0x15a   : > { %v952_v32 = vadd.f32 %v920_v7, %v885_v37  ;;  %v1106_v1 = vrot.slane %v994_v52, 1  ;;  %v1236_v34 = vmul.f32 %v3713_v22, %v2699_v16  ;;  %v1237_v36 = vmul.f32 %v3713_v22, %v2701_v17 }
 0x15b   : > { %v2163_v60 = vsel %vm2158_vm2, %v2135_v5, 0  ;;  %v953_v50 = vadd.f32 %v921_v30, %v886_v42  ;;  %v1107_v56 = vrot.slane %v995_v55, 1  ;;  %v1109_v49 = vrot.slane %v996_v59, 1 }
 0x15c   : > { %2217 = vmatpush.bf16.xpose.msra.mxu0 %v2163_v60  ;;  %v1238_v63 = vmul.f32 %v3713_v22, %v2703_v18  ;;  %v1348_v14 = vrot.slane %v1236_v34, 2  ;;  %v1349_v44 = vrot.slane %v1237_v36, 2  ;;  %v1471_v24 = vmul.f32 %v3726_v45, %v3573_v47 }
 0x15d   : > { %v1108_v43 = vsel %vm513_vm0, %v1106_v1, %v1107_v56  ;;  %v1110_v16 = vsel %vm513_vm0, %v1107_v56, %v1109_v49  ;;  %v1472_v17 = vmul.f32 %v3726_v45, %v3576_v25  ;;  %v1545_v0 = vmul.f32 %v3739_v12, %v3573_v47 }
 0x15e   : > { %v1194_v11 = vadd.f32 %v1108_v43, %v952_v32  ;;  %v1195_v9 = vadd.f32 %v1110_v16, %v953_v50  ;;  %v1350_v46 = vsel %vm756_vm1, %v1348_v14, %v1349_v44  ;;  %v1351_v18 = vrot.slane %v1238_v63, 2 }
 0x15f   : > { %v1546_v22 = vmul.f32 %v3739_v12, %v3576_v25  ;;  %v1547_v21 = vmul.f32 %v3739_v12, %v3579_v39  ;;  %v1657_v31 = vrot.slane %v1545_v0, 1  ;;  %v1787_v27 = vmul.f32 %v3749_v19, %v3573_v47  ;;  %v2152_v47 = vld [vmem:[%s4001_s4] sm:$0xff] }
 0x160   : > { %v1352_v45 = vsel %vm756_vm1, %v1349_v44, %v1351_v18  ;;  %v1436_v53 = vadd.f32 %v1350_v46, %v1194_v11  ;;  %v1788_v54 = vmul.f32 %v3749_v19, %v3576_v25  ;;  %v1789_v33 = vmul.f32 %v3749_v19, %v3579_v39 }
 0x161   : > { %v1437_v38 = vadd.f32 %v1352_v45, %v1195_v9  ;;  %v1658_v40 = vrot.slane %v1546_v22, 1  ;;  %v1660_v12 = vrot.slane %v1547_v21, 1  ;;  %v1899_v10 = vrot.slane %v1787_v27, 2 }
 0x162   : > { %v1503_v62 = vadd.f32 %v1471_v24, %v1436_v53  ;;  %v1900_v6 = vrot.slane %v1788_v54, 2  ;;  %v1902_v61 = vrot.slane %v1789_v33, 2  ;;  %v2568_v19 = vmov 0  }
 0x163   : > { %v1504_v41 = vadd.f32 %v1472_v17, %v1437_v38  ;;  %v1659_v25 = vsel %vm513_vm0, %v1657_v31, %v1658_v40  ;;  %v1661_v39 = vsel %vm513_vm0, %v1658_v40, %v1660_v12  ;;  %2348 = vmatmul.msk.bf16.vlgmr.msra.gmra.mxu0 %vm2158_vm2, %v2151_v35  ;;  %2457 = vset.pattern.permute.xlu0 %v2568_v19 }
 0x164   : > { %v1745_v4 = vadd.f32 %v1659_v25, %v1503_v62  ;;  %v1901_v48 = vsel %vm756_vm1, %v1899_v10, %v1900_v6  ;;  %v1903_v51 = vsel %vm756_vm1, %v1900_v6, %v1902_v61  ;;  %2155 = vperm.xlu0 %2457, %v2152_v47  }
 0x165   : > { %v1746_v7 = vadd.f32 %v1661_v39, %v1504_v41 }
 0x166   : > { %v1987_v23 = vadd.f32 %v1901_v48, %v1745_v4 }
 0x167   : > { %v1988_v57 = vadd.f32 %v1903_v51, %v1746_v7 }
 0x168   : > { %v2023_v2 = vadd.f32 %v3780_v28, %v1987_v23 }
 0x169   : > { %v2024_v26 = vadd.f32 %v3780_v28, %v1988_v57 }
 0x16a   : > { %vm2055_vm7 = vcmp.gt.f32.partialorder %v2023_v2, 0.0  ;;  %v2087_v8 = vmul.f32 0.01, %v2023_v2 }
 0x16b   : > { %vm2056_vm0 = vcmp.gt.f32.partialorder %v2024_v26, 0.0  ;;  %v2088_v20 = vmul.f32 0.01, %v2024_v26 }
 0x16c   : > { %v2119_v15 = vsel %vm2055_vm7, %v2023_v2, %v2087_v8 }
 0x16d   : > { %v2120_v58 = vsel %vm2056_vm0, %v2024_v26, %v2088_v20 }
 0x16e   : > { %v2143_v3 = vpack.c.bf16 %v2120_v58, %v2119_v15 }
 0x170   : > { %v2187_v30 = vsel %vm2158_vm2, %v2143_v3, 0 }
 0x171   : > { %2230 = vmatpush.bf16.xpose.msra.mxu1 %v2187_v30 }
 0x178   : > { %2349 = vmatmul.msk.bf16.vlgmr.msra.gmra.mxu1 %vm2158_vm2, %v2151_v35 }
 0x1d6   : > { %v2156_v13 = vpop.permute.xlu0 %2155 }
 0x1e0   : > { %v2219_v29 = vpop.f32.mrf.mxu0 }
 0x1e1   : > { %v2220_v37 = vadd.f32 %v2219_v29, %v2156_v13 }
 0x1e3   : > { %vm2236_vm1 = vcmp.gt.f32.partialorder %v2220_v37, 0.0  ;;  %v2238_v28 = vmul.f32 0.01, %v2220_v37 }
 0x1e5   : > { %v2240_v52 = vsel %vm2236_vm1, %v2220_v37, %v2238_v28 }
 0x1e6   : > { %2242 = vst [vmem:[%s231_s29] sm:$0xff] %v2240_v52 }
 0x1e8   : > { %v2221_v5 = vpop.f32.mrf.mxu0 }
 0x1f5   : > { %v2232_v42 = vpop.f32.mrf.mxu1 }
 0x1f6   : > { %v2233_v55 = vadd.f32 %v2232_v42, %v2156_v13 }
 0x1f8   : > { %vm2237_vm2 = vcmp.gt.f32.partialorder %v2233_v55, 0.0  ;;  %v2239_v59 = vmul.f32 0.01, %v2233_v55 }
 0x1fa   : > { %v2241_v32 = vsel %vm2237_vm2, %v2233_v55, %v2239_v59 }
 0x1fb   : > { %2243 = vst [vmem:[%s231_s29 + $0x8] sm:$0xff] %v2241_v32 }
 0x1fc   : > { %2515 = shalt.err (!%p2512_p5)
}
 0x1fd   : > { %2401 = dma.vmem_to_hbm [thread:$0]  (%p2639_p4), %s2261_s11, 256, %s2263_s12, %s2245_s13   ;;  %v2234_v1 = vpop.f32.mrf.mxu1 }
 0x1fe PF: > { %p2407_p6 = scmp.ge.s32.totalorder %s2566_s23, 2  ;;  %s2274_s25 = sand.u32 1, %s2546_s18  }
 0x1ff   : > { %s2275_s29 = scalar_lea.sflag [#allocation3], %s2274_s25 }
 0x200   : > { %p2404_p7 = pnand %p2407_p6, %p2646_p8 }
 0x202   : > { %p2405_p9 = pneg %p2404_p7 }
 0x204   : > { %2541 = dma.done.wait (%p2405_p9), %s2275_s29, 256  }
 0x205   : > { %2543 = vsyncadd (%p2405_p9), %s2275_s29, 4294967040  ;;  %s18_s23 = sadd.s32 1, %s2566_s23   ;;  %s4005_s18 = smov %s2550_s19 }
 0x206   : > { %p15_p10 = scmp.ge.s32.totalorder %s18_s23, 4   ;;  %s4006_s19 = smov %s2554_s20 }
 0x207   : > { %s4007_s20 = smov %s2652_s6  ;;  %s4008_s21 = smov %s2562_s22 }
 0x208   : > { %s4009_s22 = smov %s4011_s26  ;;  %17 = sbr.rel (!%p15_p10) target bundleno = 4 (0x4), region = 78 }
 0x20d   :  { %2281 = vsyncpa [#allocation3], 1 }
 0x20e   :  { %2283 = vsyncpa [#allocation3 + $0x1], 1 }

</bundles_post_ra>
